<compile_context>
chip_gen: v5e
topology: v5e:2x2
jax: 0.10.0
libtpu: 0.0.40
codegen_flags: <defaults>
</compile_context>

<pallas_src>
import functools
import math

import jax
import jax.numpy as jnp
from jax.experimental import pallas as pl
from jax.experimental.pallas import tpu as pltpu

# ----------------------- small BERT-like config -----------------------
VOCAB = 64
MAX_POS = 16
TYPE_VOCAB = 2
HIDDEN = 32
N_HEADS = 4
HEAD_DIM = HIDDEN // N_HEADS
N_LAYERS = 2
INTERMEDIATE = 64
N_CLASSES = 2
LN_EPS = 1e-12
LANE = 128  # lane-dense padded width for the classifier output


# --------------------------- in-kernel helpers --------------------------
def _layernorm(x, gamma, beta):
    mean = jnp.mean(x, axis=-1, keepdims=True)
    xc = x - mean
    var = jnp.mean(xc * xc, axis=-1, keepdims=True)
    inv = jax.lax.rsqrt(var + LN_EPS)
    return xc * inv * gamma + beta


def _gelu(x):
    # TODO(synk): HF BERT default is exact (erf) GELU; tanh approximation used here.
    return 0.5 * x * (1.0 + jnp.tanh(0.7978845608028654 * (x + 0.044715 * x * x * x)))


# ----------------------------- fused kernel -----------------------------
def _fused_bert_kernel(emb_ref, addmask_ref, emb_g_ref, emb_b_ref,
                       wqkv_ref, bqkv_ref, wo_ref, bo_ref,
                       ln1_g_ref, ln1_b_ref, wi_ref, bi_ref,
                       wo2_ref, bo2_ref, ln2_g_ref, ln2_b_ref,
                       pool_w_ref, pool_b_ref, out_w_ref, out_b_ref,
                       logits_ref, *, seq_len):
    # One grid program == BLOCK_B batch rows packed into the sublane dimension.
    x = emb_ref[0]                                               # (M, H), M = BLOCK_B*S
    m_rows = x.shape[0]
    block_b = m_rows // seq_len

    h = _layernorm(x, emb_g_ref[...], emb_b_ref[...])

    # Precomputed additive mask: 0 for (same batch row AND key attended), else -10000.
    addmask = addmask_ref[0]                                     # (M, M)

    for l in range(N_LAYERS):                                    # static unroll (tiny)
        w_qkv = wqkv_ref[l]                                      # (H, 3H) bf16
        b_qkv = bqkv_ref[l]                                      # (1, 3H) f32
        w_o = wo_ref[l]                                          # (H, H)  f32
        b_o = bo_ref[l]                                          # (1, H)

        # Fused QKV projection: one bf16 MXU push, f32 accumulation.
        # 1/sqrt(HEAD_DIM) is already folded into the Q columns of w_qkv / b_qkv.
        qkv = jnp.dot(h.astype(jnp.bfloat16), w_qkv,
                      preferred_element_type=jnp.float32) + b_qkv        # (M, 3H)
        q = qkv[:, :HIDDEN]
        k = qkv[:, HIDDEN:2 * HIDDEN]
        v = qkv[:, 2 * HIDDEN:]

        # One transpose per layer; per-head key slices become sublane-aligned.
        kT = k.T                                                  # (H, M)

        # Multi-head attention; output projection fused into per-head matmul-acc.
        attn_out = b_o                                            # (1, H) -> broadcasts up
        for hd in range(N_HEADS):                                 # static unroll
            sl = slice(hd * HEAD_DIM, (hd + 1) * HEAD_DIM)
            qh = q[:, sl]                                         # (M, Dh)
            vh = v[:, sl]                                         # (M, Dh)
            khT = kT[sl, :]                                       # (Dh, M) sublane slice
            s = jnp.dot(qh, khT, preferred_element_type=jnp.float32)      # (M, M)
            s = s + addmask
            s = s - jnp.max(s, axis=-1, keepdims=True)
            p = jnp.exp(s)
            denom = jnp.sum(p, axis=-1, keepdims=True)
            p = p * pl.reciprocal(denom, approx=True)             # divide on the EUP slot
            o = jnp.dot(p, vh, preferred_element_type=jnp.float32)        # (M, Dh)
            attn_out = attn_out + jnp.dot(
                o, w_o[sl, :], preferred_element_type=jnp.float32)        # (M, H)

        h1 = _layernorm(attn_out + h, ln1_g_ref[l], ln1_b_ref[l])

        ffn = jnp.dot(h1.astype(jnp.bfloat16), wi_ref[l],
                      preferred_element_type=jnp.float32) + bi_ref[l]     # (M, I)
        ffn = _gelu(ffn)
        ffn_out = jnp.dot(ffn.astype(jnp.bfloat16), wo2_ref[l],
                          preferred_element_type=jnp.float32) + bo2_ref[l]
        h = _layernorm(ffn_out + h1, ln2_g_ref[l], ln2_b_ref[l])

    # BERT pooler on each batch row's [CLS] token: tanh(W * h_cls + b).
    cls = jnp.concatenate(
        [h[bb * seq_len: bb * seq_len + 1, :] for bb in range(block_b)], axis=0)  # (BLOCK_B, H)
    pooled = jnp.tanh(
        jnp.dot(cls, pool_w_ref[...], preferred_element_type=jnp.float32)
        + pool_b_ref[...])
    # Dropout(p=0.3): identity at inference (eval mode).
    # Classifier head, lane-dense padded to 128 output columns.
    logits = jnp.dot(pooled, out_w_ref[...],
                     preferred_element_type=jnp.float32) + out_b_ref[...]  # (BLOCK_B, LANE)
    logits_ref[0] = logits.astype(logits_ref.dtype)


# --------------------------- parameter init ----------------------------
def init_params(key):
    keys = jax.random.split(key, 5)

    def dense(k, shape):
        return jax.random.normal(k, shape, jnp.float32) * 0.02

    params = {
        "word_emb": dense(keys[0], (VOCAB, HIDDEN)),
        "pos_emb": dense(keys[1], (MAX_POS, HIDDEN)),
        "type_emb": dense(keys[2], (TYPE_VOCAB, HIDDEN)),
        "emb_ln_g": jnp.ones((HIDDEN,), jnp.float32),
        "emb_ln_b": jnp.zeros((HIDDEN,), jnp.float32),
        "pool_w": dense(keys[3], (HIDDEN, HIDDEN)),
        "pool_b": jnp.zeros((HIDDEN,), jnp.float32),
        "out_w": dense(keys[4], (HIDDEN, N_CLASSES)),
        "out_b": jnp.zeros((N_CLASSES,), jnp.float32),
        "layers": [],
    }
    for l in range(N_LAYERS):
        lk = jax.random.split(jax.random.fold_in(key, 100 + l), 6)
        params["layers"].append({
            "wq": dense(lk[0], (HIDDEN, HIDDEN)), "bq": jnp.zeros((HIDDEN,), jnp.float32),
            "wk": dense(lk[1], (HIDDEN, HIDDEN)), "bk": jnp.zeros((HIDDEN,), jnp.float32),
            "wv": dense(lk[2], (HIDDEN, HIDDEN)), "bv": jnp.zeros((HIDDEN,), jnp.float32),
            "wo": dense(lk[3], (HIDDEN, HIDDEN)), "bo": jnp.zeros((HIDDEN,), jnp.float32),
            "ln1_g": jnp.ones((HIDDEN,), jnp.float32), "ln1_b": jnp.zeros((HIDDEN,), jnp.float32),
            "wi": dense(lk[4], (HIDDEN, INTERMEDIATE)), "bi": jnp.zeros((INTERMEDIATE,), jnp.float32),
            "wo2": dense(lk[5], (INTERMEDIATE, HIDDEN)), "bo2": jnp.zeros((HIDDEN,), jnp.float32),
            "ln2_g": jnp.ones((HIDDEN,), jnp.float32), "ln2_b": jnp.zeros((HIDDEN,), jnp.float32),
        })
    return params


def pack_params(p):
    """One-time packing: stack per-layer weights along a leading layer axis, fuse QKV,
    fold the 1/sqrt(head_dim) scale into the Q columns (weights and bias), cast the
    big matmul weights to bf16, and zero-pad the classifier to a 128-lane slab."""
    ls = p["layers"]
    scale = 1.0 / math.sqrt(HEAD_DIM)

    def stk(f):
        return jnp.stack([f(l) for l in ls])

    return {
        "word_emb": p["word_emb"],
        "pos_emb": p["pos_emb"],
        "type_emb": p["type_emb"],
        "emb_ln_g": p["emb_ln_g"].reshape(1, HIDDEN),
        "emb_ln_b": p["emb_ln_b"].reshape(1, HIDDEN),
        # Fused QKV with attention scale folded into Q (bf16 matmul operands).
        "wqkv": stk(lambda l: jnp.concatenate(
            [l["wq"] * scale, l["wk"], l["wv"]], axis=1)).astype(jnp.bfloat16),
        "bqkv": stk(lambda l: jnp.concatenate(
            [l["bq"] * scale, l["bk"], l["bv"]]).reshape(1, 3 * HIDDEN)),
        # Output projection stays f32: it is sliced per-head along sublanes in-kernel.
        "wo": stk(lambda l: l["wo"]),
        "bo": stk(lambda l: l["bo"].reshape(1, HIDDEN)),
        "ln1_g": stk(lambda l: l["ln1_g"].reshape(1, HIDDEN)),
        "ln1_b": stk(lambda l: l["ln1_b"].reshape(1, HIDDEN)),
        "wi": stk(lambda l: l["wi"]).astype(jnp.bfloat16),
        "bi": stk(lambda l: l["bi"].reshape(1, INTERMEDIATE)),
        "wo2": stk(lambda l: l["wo2"]).astype(jnp.bfloat16),
        "bo2": stk(lambda l: l["bo2"].reshape(1, HIDDEN)),
        "ln2_g": stk(lambda l: l["ln2_g"].reshape(1, HIDDEN)),
        "ln2_b": stk(lambda l: l["ln2_b"].reshape(1, HIDDEN)),
        "pool_w": p["pool_w"],
        "pool_b": p["pool_b"].reshape(1, HIDDEN),
        "out_w": jnp.zeros((HIDDEN, LANE), jnp.float32).at[:, :N_CLASSES].set(p["out_w"]),
        "out_b": jnp.zeros((1, LANE), jnp.float32).at[:, :N_CLASSES].set(
            p["out_b"].reshape(1, N_CLASSES)),
    }


# ------------------------------ forward --------------------------------
def fused_forward(packed, input_ids, attention_mask):
    B, S = input_ids.shape

    # Batch-block size: largest divisor of B with BLOCK_B*S <= 128 sublanes.
    cap = max(1, 128 // S)
    block_b = max(d for d in range(1, min(B, cap) + 1) if B % d == 0)
    num_blocks = B // block_b
    M = block_b * S

    # Embedding lookups are gathers -> plain JAX glue (token_type_ids == 0).
    we = jnp.take(packed["word_emb"], input_ids, axis=0)               # (B,S,H)
    pe = packed["pos_emb"][:S][None, :, :]                             # (1,S,H)
    te = packed["type_emb"][0][None, None, :]                          # (1,1,H)
    emb = (we + pe + te).reshape(num_blocks, M, HIDDEN)                # (nb, M, H)

    # Precomputed additive attention mask: block-diagonal over the batch rows packed
    # into one program, combined with the per-token key mask (HF-style -10000).
    amf = attention_mask.astype(jnp.float32).reshape(num_blocks, 1, M)  # key mask
    row_id = jnp.arange(M) // S
    same_row = (row_id[:, None] == row_id[None, :]).astype(jnp.float32)  # (M, M)
    addmask = (1.0 - amf * same_row[None]) * -10000.0                   # (nb, M, M)

    full3 = lambda shape: pl.BlockSpec(shape, lambda b: (0, 0, 0))
    full2 = lambda shape: pl.BlockSpec(shape, lambda b: (0, 0))

    logits_pad = pl.pallas_call(
        functools.partial(_fused_bert_kernel, seq_len=S),
        out_shape=jax.ShapeDtypeStruct((num_blocks, block_b, LANE), jnp.float32),
        grid=(num_blocks,),
        in_specs=[
            pl.BlockSpec((1, M, HIDDEN), lambda b: (b, 0, 0)),         # embeddings block
            pl.BlockSpec((1, M, M), lambda b: (b, 0, 0)),              # additive mask
            full2((1, HIDDEN)), full2((1, HIDDEN)),                    # emb LN
            full3((N_LAYERS, HIDDEN, 3 * HIDDEN)),                     # fused QKV W (bf16)
            full3((N_LAYERS, 1, 3 * HIDDEN)),                          # fused QKV b
            full3((N_LAYERS, HIDDEN, HIDDEN)),                         # attn out W
            full3((N_LAYERS, 1, HIDDEN)),                              # attn out b
            full3((N_LAYERS, 1, HIDDEN)), full3((N_LAYERS, 1, HIDDEN)),  # LN1
            full3((N_LAYERS, HIDDEN, INTERMEDIATE)),                   # FFN in W (bf16)
            full3((N_LAYERS, 1, INTERMEDIATE)),                        # FFN in b
            full3((N_LAYERS, INTERMEDIATE, HIDDEN)),                   # FFN out W (bf16)
            full3((N_LAYERS, 1, HIDDEN)),                              # FFN out b
            full3((N_LAYERS, 1, HIDDEN)), full3((N_LAYERS, 1, HIDDEN)),  # LN2
            full2((HIDDEN, HIDDEN)), full2((1, HIDDEN)),               # pooler
            full2((HIDDEN, LANE)), full2((1, LANE)),                   # classifier (padded)
        ],
        out_specs=pl.BlockSpec((1, block_b, LANE), lambda b: (b, 0, 0)),
        compiler_params=pltpu.CompilerParams(
            dimension_semantics=("parallel",)),                        # megacore when nb >= 2
    )(emb, addmask, packed["emb_ln_g"], packed["emb_ln_b"],
      packed["wqkv"], packed["bqkv"], packed["wo"], packed["bo"],
      packed["ln1_g"], packed["ln1_b"], packed["wi"], packed["bi"],
      packed["wo2"], packed["bo2"], packed["ln2_g"], packed["ln2_b"],
      packed["pool_w"], packed["pool_b"], packed["out_w"], packed["out_b"])

    return logits_pad.reshape(B, LANE)[:, :N_CLASSES]                  # (B, n_classes)


# -------------------------------- main ----------------------------------
if __name__ == "__main__":
    key = jax.random.PRNGKey(0)
    pkey, ikey = jax.random.split(key)
    params = init_params(pkey)
    packed = pack_params(params)

    B, S = 2, 8
    input_ids = jax.random.randint(ikey, (B, S), 0, VOCAB, dtype=jnp.int32)
    attention_mask = jnp.array([[1, 1, 1, 1, 1, 1, 1, 1],
                                [1, 1, 1, 1, 1, 1, 0, 0]], dtype=jnp.int32)

    logits = jax.jit(fused_forward)(packed, input_ids, attention_mask)
    logits = jax.block_until_ready(logits)
    assert logits.shape == (B, N_CLASSES)
    assert bool(jnp.all(jnp.isfinite(logits)))
    print("KERNEL_OK")
</pallas_src>

<mosaic_0001>
module attributes {stable_mosaic.version = 11 : i64} {
  func.func @_fused_bert_kernel(%arg0: i32, %arg1: memref<1x16x32xf32, #tpu.memory_space<vmem>>, %arg2: memref<1x16x16xf32, #tpu.memory_space<vmem>>, %arg3: memref<1x32xf32, #tpu.memory_space<vmem>>, %arg4: memref<1x32xf32, #tpu.memory_space<vmem>>, %arg5: memref<2x32x96xbf16, #tpu.memory_space<vmem>>, %arg6: memref<2x1x96xf32, #tpu.memory_space<vmem>>, %arg7: memref<2x32x32xf32, #tpu.memory_space<vmem>>, %arg8: memref<2x1x32xf32, #tpu.memory_space<vmem>>, %arg9: memref<2x1x32xf32, #tpu.memory_space<vmem>>, %arg10: memref<2x1x32xf32, #tpu.memory_space<vmem>>, %arg11: memref<2x32x64xbf16, #tpu.memory_space<vmem>>, %arg12: memref<2x1x64xf32, #tpu.memory_space<vmem>>, %arg13: memref<2x64x32xbf16, #tpu.memory_space<vmem>>, %arg14: memref<2x1x32xf32, #tpu.memory_space<vmem>>, %arg15: memref<2x1x32xf32, #tpu.memory_space<vmem>>, %arg16: memref<2x1x32xf32, #tpu.memory_space<vmem>>, %arg17: memref<32x32xf32, #tpu.memory_space<vmem>>, %arg18: memref<1x32xf32, #tpu.memory_space<vmem>>, %arg19: memref<32x128xf32, #tpu.memory_space<vmem>>, %arg20: memref<1x128xf32, #tpu.memory_space<vmem>>, %arg21: memref<1x2x128xf32, #tpu.memory_space<vmem>>) attributes {dimension_semantics = [#tpu.dimension_semantics<parallel>], iteration_bounds = array<i64: 1>, scalar_prefetch = 0 : i64, scratch_operands = 0 : i64, tpu.core_type = #tpu.core_type<tc>, window_params = [{transform_indices = @transform_0, window_bounds = array<i64: 1, 16, 32>}, {transform_indices = @transform_1, window_bounds = array<i64: 1, 16, 16>}, {pipeline_mode = #tpu.pipeline_mode<synchronous>, transform_indices = @transform_2, window_bounds = array<i64: 1, 32>}, {pipeline_mode = #tpu.pipeline_mode<synchronous>, transform_indices = @transform_3, window_bounds = array<i64: 1, 32>}, {pipeline_mode = #tpu.pipeline_mode<synchronous>, transform_indices = @transform_4, window_bounds = array<i64: 2, 32, 96>}, {pipeline_mode = #tpu.pipeline_mode<synchronous>, transform_indices = @transform_5, window_bounds = array<i64: 2, 1, 96>}, {pipeline_mode = #tpu.pipeline_mode<synchronous>, transform_indices = @transform_6, window_bounds = array<i64: 2, 32, 32>}, {pipeline_mode = #tpu.pipeline_mode<synchronous>, transform_indices = @transform_7, window_bounds = array<i64: 2, 1, 32>}, {pipeline_mode = #tpu.pipeline_mode<synchronous>, transform_indices = @transform_8, window_bounds = array<i64: 2, 1, 32>}, {pipeline_mode = #tpu.pipeline_mode<synchronous>, transform_indices = @transform_9, window_bounds = array<i64: 2, 1, 32>}, {pipeline_mode = #tpu.pipeline_mode<synchronous>, transform_indices = @transform_10, window_bounds = array<i64: 2, 32, 64>}, {pipeline_mode = #tpu.pipeline_mode<synchronous>, transform_indices = @transform_11, window_bounds = array<i64: 2, 1, 64>}, {pipeline_mode = #tpu.pipeline_mode<synchronous>, transform_indices = @transform_12, window_bounds = array<i64: 2, 64, 32>}, {pipeline_mode = #tpu.pipeline_mode<synchronous>, transform_indices = @transform_13, window_bounds = array<i64: 2, 1, 32>}, {pipeline_mode = #tpu.pipeline_mode<synchronous>, transform_indices = @transform_14, window_bounds = array<i64: 2, 1, 32>}, {pipeline_mode = #tpu.pipeline_mode<synchronous>, transform_indices = @transform_15, window_bounds = array<i64: 2, 1, 32>}, {pipeline_mode = #tpu.pipeline_mode<synchronous>, transform_indices = @transform_16, window_bounds = array<i64: 32, 32>}, {pipeline_mode = #tpu.pipeline_mode<synchronous>, transform_indices = @transform_17, window_bounds = array<i64: 1, 32>}, {pipeline_mode = #tpu.pipeline_mode<synchronous>, transform_indices = @transform_18, window_bounds = array<i64: 32, 128>}, {pipeline_mode = #tpu.pipeline_mode<synchronous>, transform_indices = @transform_19, window_bounds = array<i64: 1, 128>}, {transform_indices = @transform_20, window_bounds = array<i64: 1, 2, 128>}]} {
    %c0 = arith.constant 0 : index
    %c0_0 = arith.constant 0 : index
    %c0_1 = arith.constant 0 : index
    %0 = vector.load %arg1[%c0, %c0_0, %c0_1] : memref<1x16x32xf32, #tpu.memory_space<vmem>>, vector<1x16x32xf32>
    %1 = vector.shape_cast %0 : vector<1x16x32xf32> to vector<16x32xf32>
    %c0_2 = arith.constant 0 : index
    %c0_3 = arith.constant 0 : index
    %2 = vector.load %arg3[%c0_2, %c0_3] : memref<1x32xf32, #tpu.memory_space<vmem>>, vector<1x32xf32>
    %c0_4 = arith.constant 0 : index
    %c0_5 = arith.constant 0 : index
    %3 = vector.load %arg4[%c0_4, %c0_5] : memref<1x32xf32, #tpu.memory_space<vmem>>, vector<1x32xf32>
    %cst = arith.constant dense<0.000000e+00> : vector<16xf32>
    %4 = vector.multi_reduction <add>, %1, %cst [1] : vector<16x32xf32> to vector<16xf32>
    %5 = vector.shape_cast %4 : vector<16xf32> to vector<16x1xf32>
    %cst_6 = arith.constant 3.200000e+01 : f32
    %6 = vector.broadcast %cst_6 : f32 to vector<16x1xf32>
    %7 = arith.divf %5, %6 : vector<16x1xf32>
    %8 = vector.broadcast %7 : vector<16x1xf32> to vector<16x32xf32>
    %9 = arith.subf %1, %8 : vector<16x32xf32>
    %10 = arith.mulf %9, %9 : vector<16x32xf32>
    %cst_7 = arith.constant dense<0.000000e+00> : vector<16xf32>
    %11 = vector.multi_reduction <add>, %10, %cst_7 [1] : vector<16x32xf32> to vector<16xf32>
    %12 = vector.shape_cast %11 : vector<16xf32> to vector<16x1xf32>
    %cst_8 = arith.constant 3.200000e+01 : f32
    %13 = vector.broadcast %cst_8 : f32 to vector<16x1xf32>
    %14 = arith.divf %12, %13 : vector<16x1xf32>
    %cst_9 = arith.constant 9.99999996E-13 : f32
    %15 = vector.broadcast %cst_9 : f32 to vector<16x1xf32>
    %16 = arith.addf %14, %15 : vector<16x1xf32>
    %17 = math.rsqrt %16 : vector<16x1xf32>
    %18 = vector.broadcast %17 : vector<16x1xf32> to vector<16x32xf32>
    %19 = arith.mulf %9, %18 : vector<16x32xf32>
    %20 = vector.broadcast %2 : vector<1x32xf32> to vector<16x32xf32>
    %21 = arith.mulf %19, %20 : vector<16x32xf32>
    %22 = vector.broadcast %3 : vector<1x32xf32> to vector<16x32xf32>
    %23 = arith.addf %21, %22 : vector<16x32xf32>
    %c0_10 = arith.constant 0 : index
    %c0_11 = arith.constant 0 : index
    %c0_12 = arith.constant 0 : index
    %24 = vector.load %arg2[%c0_10, %c0_11, %c0_12] : memref<1x16x16xf32, #tpu.memory_space<vmem>>, vector<1x16x16xf32>
    %25 = vector.shape_cast %24 : vector<1x16x16xf32> to vector<16x16xf32>
    %c0_13 = arith.constant 0 : index
    %c0_14 = arith.constant 0 : index
    %c0_15 = arith.constant 0 : index
    %26 = vector.load %arg5[%c0_13, %c0_14, %c0_15] : memref<2x32x96xbf16, #tpu.memory_space<vmem>>, vector<1x32x96xbf16>
    %27 = vector.shape_cast %26 : vector<1x32x96xbf16> to vector<32x96xbf16>
    %c0_16 = arith.constant 0 : index
    %c0_17 = arith.constant 0 : index
    %c0_18 = arith.constant 0 : index
    %28 = vector.load %arg6[%c0_16, %c0_17, %c0_18] : memref<2x1x96xf32, #tpu.memory_space<vmem>>, vector<1x1x96xf32>
    %29 = vector.shape_cast %28 : vector<1x1x96xf32> to vector<1x96xf32>
    %c0_19 = arith.constant 0 : index
    %c0_20 = arith.constant 0 : index
    %c0_21 = arith.constant 0 : index
    %30 = vector.load %arg7[%c0_19, %c0_20, %c0_21] : memref<2x32x32xf32, #tpu.memory_space<vmem>>, vector<1x32x32xf32>
    %31 = vector.shape_cast %30 : vector<1x32x32xf32> to vector<32x32xf32>
    %c0_22 = arith.constant 0 : index
    %c0_23 = arith.constant 0 : index
    %c0_24 = arith.constant 0 : index
    %32 = vector.load %arg8[%c0_22, %c0_23, %c0_24] : memref<2x1x32xf32, #tpu.memory_space<vmem>>, vector<1x1x32xf32>
    %33 = vector.shape_cast %32 : vector<1x1x32xf32> to vector<1x32xf32>
    %34 = arith.truncf %23 : vector<16x32xf32> to vector<16x32xbf16>
    %cst_25 = arith.constant dense<0.000000e+00> : vector<16x96xf32>
    %35 = tpu.matmul %34, %27, %cst_25 {dimension_numbers = #tpu.dot_dimension_numbers<[1], [0], [0], [1], [0, 0, 1, 1], [], []>} : vector<16x32xbf16>, vector<32x96xbf16>, vector<16x96xf32> -> vector<16x96xf32>
    %36 = vector.broadcast %29 : vector<1x96xf32> to vector<16x96xf32>
    %37 = arith.addf %35, %36 : vector<16x96xf32>
    %38 = vector.extract_strided_slice %37 {offsets = [0, 0], sizes = [16, 32], strides = [1, 1]} : vector<16x96xf32> to vector<16x32xf32>
    %39 = vector.extract_strided_slice %37 {offsets = [0, 32], sizes = [16, 32], strides = [1, 1]} : vector<16x96xf32> to vector<16x32xf32>
    %40 = vector.extract_strided_slice %37 {offsets = [0, 64], sizes = [16, 32], strides = [1, 1]} : vector<16x96xf32> to vector<16x32xf32>
    %41 = tpu.transpose %39, [1, 0] : vector<16x32xf32> -> vector<32x16xf32>
    %42 = vector.extract_strided_slice %38 {offsets = [0, 0], sizes = [16, 8], strides = [1, 1]} : vector<16x32xf32> to vector<16x8xf32>
    %43 = vector.extract_strided_slice %40 {offsets = [0, 0], sizes = [16, 8], strides = [1, 1]} : vector<16x32xf32> to vector<16x8xf32>
    %44 = vector.extract_strided_slice %41 {offsets = [0, 0], sizes = [8, 16], strides = [1, 1]} : vector<32x16xf32> to vector<8x16xf32>
    %cst_26 = arith.constant dense<0.000000e+00> : vector<16x16xf32>
    %45 = tpu.matmul %42, %44, %cst_26 {dimension_numbers = #tpu.dot_dimension_numbers<[1], [0], [0], [1], [0, 0, 1, 1], [], []>} : vector<16x8xf32>, vector<8x16xf32>, vector<16x16xf32> -> vector<16x16xf32>
    %46 = arith.addf %45, %25 : vector<16x16xf32>
    %cst_27 = arith.constant dense<0xFF800000> : vector<16xf32>
    %47 = vector.multi_reduction <maximumf>, %46, %cst_27 [1] : vector<16x16xf32> to vector<16xf32>
    %48 = vector.shape_cast %47 : vector<16xf32> to vector<16x1xf32>
    %49 = vector.broadcast %48 : vector<16x1xf32> to vector<16x16xf32>
    %50 = arith.subf %46, %49 : vector<16x16xf32>
    %51 = math.exp %50 : vector<16x16xf32>
    %cst_28 = arith.constant dense<0.000000e+00> : vector<16xf32>
    %52 = vector.multi_reduction <add>, %51, %cst_28 [1] : vector<16x16xf32> to vector<16xf32>
    %53 = vector.shape_cast %52 : vector<16xf32> to vector<16x1xf32>
    %54 = tpu.reciprocal %53 {approx = true} : vector<16x1xf32> -> vector<16x1xf32>
    %55 = vector.broadcast %54 : vector<16x1xf32> to vector<16x16xf32>
    %56 = arith.mulf %51, %55 : vector<16x16xf32>
    %cst_29 = arith.constant dense<0.000000e+00> : vector<16x8xf32>
    %57 = tpu.matmul %56, %43, %cst_29 {dimension_numbers = #tpu.dot_dimension_numbers<[1], [0], [0], [1], [0, 0, 1, 1], [], []>} : vector<16x16xf32>, vector<16x8xf32>, vector<16x8xf32> -> vector<16x8xf32>
    %58 = vector.extract_strided_slice %31 {offsets = [0, 0], sizes = [8, 32], strides = [1, 1]} : vector<32x32xf32> to vector<8x32xf32>
    %cst_30 = arith.constant dense<0.000000e+00> : vector<16x32xf32>
    %59 = tpu.matmul %57, %58, %cst_30 {dimension_numbers = #tpu.dot_dimension_numbers<[1], [0], [0], [1], [0, 0, 1, 1], [], []>} : vector<16x8xf32>, vector<8x32xf32>, vector<16x32xf32> -> vector<16x32xf32>
    %60 = vector.broadcast %33 : vector<1x32xf32> to vector<16x32xf32>
    %61 = arith.addf %60, %59 : vector<16x32xf32>
    %62 = vector.extract_strided_slice %38 {offsets = [0, 8], sizes = [16, 8], strides = [1, 1]} : vector<16x32xf32> to vector<16x8xf32>
    %63 = vector.extract_strided_slice %40 {offsets = [0, 8], sizes = [16, 8], strides = [1, 1]} : vector<16x32xf32> to vector<16x8xf32>
    %64 = vector.extract_strided_slice %41 {offsets = [8, 0], sizes = [8, 16], strides = [1, 1]} : vector<32x16xf32> to vector<8x16xf32>
    %cst_31 = arith.constant dense<0.000000e+00> : vector<16x16xf32>
    %65 = tpu.matmul %62, %64, %cst_31 {dimension_numbers = #tpu.dot_dimension_numbers<[1], [0], [0], [1], [0, 0, 1, 1], [], []>} : vector<16x8xf32>, vector<8x16xf32>, vector<16x16xf32> -> vector<16x16xf32>
    %66 = arith.addf %65, %25 : vector<16x16xf32>
    %cst_32 = arith.constant dense<0xFF800000> : vector<16xf32>
    %67 = vector.multi_reduction <maximumf>, %66, %cst_32 [1] : vector<16x16xf32> to vector<16xf32>
    %68 = vector.shape_cast %67 : vector<16xf32> to vector<16x1xf32>
    %69 = vector.broadcast %68 : vector<16x1xf32> to vector<16x16xf32>
    %70 = arith.subf %66, %69 : vector<16x16xf32>
    %71 = math.exp %70 : vector<16x16xf32>
    %cst_33 = arith.constant dense<0.000000e+00> : vector<16xf32>
    %72 = vector.multi_reduction <add>, %71, %cst_33 [1] : vector<16x16xf32> to vector<16xf32>
    %73 = vector.shape_cast %72 : vector<16xf32> to vector<16x1xf32>
    %74 = tpu.reciprocal %73 {approx = true} : vector<16x1xf32> -> vector<16x1xf32>
    %75 = vector.broadcast %74 : vector<16x1xf32> to vector<16x16xf32>
    %76 = arith.mulf %71, %75 : vector<16x16xf32>
    %cst_34 = arith.constant dense<0.000000e+00> : vector<16x8xf32>
    %77 = tpu.matmul %76, %63, %cst_34 {dimension_numbers = #tpu.dot_dimension_numbers<[1], [0], [0], [1], [0, 0, 1, 1], [], []>} : vector<16x16xf32>, vector<16x8xf32>, vector<16x8xf32> -> vector<16x8xf32>
    %78 = vector.extract_strided_slice %31 {offsets = [8, 0], sizes = [8, 32], strides = [1, 1]} : vector<32x32xf32> to vector<8x32xf32>
    %cst_35 = arith.constant dense<0.000000e+00> : vector<16x32xf32>
    %79 = tpu.matmul %77, %78, %cst_35 {dimension_numbers = #tpu.dot_dimension_numbers<[1], [0], [0], [1], [0, 0, 1, 1], [], []>} : vector<16x8xf32>, vector<8x32xf32>, vector<16x32xf32> -> vector<16x32xf32>
    %80 = arith.addf %61, %79 : vector<16x32xf32>
    %81 = vector.extract_strided_slice %38 {offsets = [0, 16], sizes = [16, 8], strides = [1, 1]} : vector<16x32xf32> to vector<16x8xf32>
    %82 = vector.extract_strided_slice %40 {offsets = [0, 16], sizes = [16, 8], strides = [1, 1]} : vector<16x32xf32> to vector<16x8xf32>
    %83 = vector.extract_strided_slice %41 {offsets = [16, 0], sizes = [8, 16], strides = [1, 1]} : vector<32x16xf32> to vector<8x16xf32>
    %cst_36 = arith.constant dense<0.000000e+00> : vector<16x16xf32>
    %84 = tpu.matmul %81, %83, %cst_36 {dimension_numbers = #tpu.dot_dimension_numbers<[1], [0], [0], [1], [0, 0, 1, 1], [], []>} : vector<16x8xf32>, vector<8x16xf32>, vector<16x16xf32> -> vector<16x16xf32>
    %85 = arith.addf %84, %25 : vector<16x16xf32>
    %cst_37 = arith.constant dense<0xFF800000> : vector<16xf32>
    %86 = vector.multi_reduction <maximumf>, %85, %cst_37 [1] : vector<16x16xf32> to vector<16xf32>
    %87 = vector.shape_cast %86 : vector<16xf32> to vector<16x1xf32>
    %88 = vector.broadcast %87 : vector<16x1xf32> to vector<16x16xf32>
    %89 = arith.subf %85, %88 : vector<16x16xf32>
    %90 = math.exp %89 : vector<16x16xf32>
    %cst_38 = arith.constant dense<0.000000e+00> : vector<16xf32>
    %91 = vector.multi_reduction <add>, %90, %cst_38 [1] : vector<16x16xf32> to vector<16xf32>
    %92 = vector.shape_cast %91 : vector<16xf32> to vector<16x1xf32>
    %93 = tpu.reciprocal %92 {approx = true} : vector<16x1xf32> -> vector<16x1xf32>
    %94 = vector.broadcast %93 : vector<16x1xf32> to vector<16x16xf32>
    %95 = arith.mulf %90, %94 : vector<16x16xf32>
    %cst_39 = arith.constant dense<0.000000e+00> : vector<16x8xf32>
    %96 = tpu.matmul %95, %82, %cst_39 {dimension_numbers = #tpu.dot_dimension_numbers<[1], [0], [0], [1], [0, 0, 1, 1], [], []>} : vector<16x16xf32>, vector<16x8xf32>, vector<16x8xf32> -> vector<16x8xf32>
    %97 = vector.extract_strided_slice %31 {offsets = [16, 0], sizes = [8, 32], strides = [1, 1]} : vector<32x32xf32> to vector<8x32xf32>
    %cst_40 = arith.constant dense<0.000000e+00> : vector<16x32xf32>
    %98 = tpu.matmul %96, %97, %cst_40 {dimension_numbers = #tpu.dot_dimension_numbers<[1], [0], [0], [1], [0, 0, 1, 1], [], []>} : vector<16x8xf32>, vector<8x32xf32>, vector<16x32xf32> -> vector<16x32xf32>
    %99 = arith.addf %80, %98 : vector<16x32xf32>
    %100 = vector.extract_strided_slice %38 {offsets = [0, 24], sizes = [16, 8], strides = [1, 1]} : vector<16x32xf32> to vector<16x8xf32>
    %101 = vector.extract_strided_slice %40 {offsets = [0, 24], sizes = [16, 8], strides = [1, 1]} : vector<16x32xf32> to vector<16x8xf32>
    %102 = vector.extract_strided_slice %41 {offsets = [24, 0], sizes = [8, 16], strides = [1, 1]} : vector<32x16xf32> to vector<8x16xf32>
    %cst_41 = arith.constant dense<0.000000e+00> : vector<16x16xf32>
    %103 = tpu.matmul %100, %102, %cst_41 {dimension_numbers = #tpu.dot_dimension_numbers<[1], [0], [0], [1], [0, 0, 1, 1], [], []>} : vector<16x8xf32>, vector<8x16xf32>, vector<16x16xf32> -> vector<16x16xf32>
    %104 = arith.addf %103, %25 : vector<16x16xf32>
    %cst_42 = arith.constant dense<0xFF800000> : vector<16xf32>
    %105 = vector.multi_reduction <maximumf>, %104, %cst_42 [1] : vector<16x16xf32> to vector<16xf32>
    %106 = vector.shape_cast %105 : vector<16xf32> to vector<16x1xf32>
    %107 = vector.broadcast %106 : vector<16x1xf32> to vector<16x16xf32>
    %108 = arith.subf %104, %107 : vector<16x16xf32>
    %109 = math.exp %108 : vector<16x16xf32>
    %cst_43 = arith.constant dense<0.000000e+00> : vector<16xf32>
    %110 = vector.multi_reduction <add>, %109, %cst_43 [1] : vector<16x16xf32> to vector<16xf32>
    %111 = vector.shape_cast %110 : vector<16xf32> to vector<16x1xf32>
    %112 = tpu.reciprocal %111 {approx = true} : vector<16x1xf32> -> vector<16x1xf32>
    %113 = vector.broadcast %112 : vector<16x1xf32> to vector<16x16xf32>
    %114 = arith.mulf %109, %113 : vector<16x16xf32>
    %cst_44 = arith.constant dense<0.000000e+00> : vector<16x8xf32>
    %115 = tpu.matmul %114, %101, %cst_44 {dimension_numbers = #tpu.dot_dimension_numbers<[1], [0], [0], [1], [0, 0, 1, 1], [], []>} : vector<16x16xf32>, vector<16x8xf32>, vector<16x8xf32> -> vector<16x8xf32>
    %116 = vector.extract_strided_slice %31 {offsets = [24, 0], sizes = [8, 32], strides = [1, 1]} : vector<32x32xf32> to vector<8x32xf32>
    %cst_45 = arith.constant dense<0.000000e+00> : vector<16x32xf32>
    %117 = tpu.matmul %115, %116, %cst_45 {dimension_numbers = #tpu.dot_dimension_numbers<[1], [0], [0], [1], [0, 0, 1, 1], [], []>} : vector<16x8xf32>, vector<8x32xf32>, vector<16x32xf32> -> vector<16x32xf32>
    %118 = arith.addf %99, %117 : vector<16x32xf32>
    %119 = arith.addf %118, %23 : vector<16x32xf32>
    %c0_46 = arith.constant 0 : index
    %c0_47 = arith.constant 0 : index
    %c0_48 = arith.constant 0 : index
    %120 = vector.load %arg9[%c0_46, %c0_47, %c0_48] : memref<2x1x32xf32, #tpu.memory_space<vmem>>, vector<1x1x32xf32>
    %121 = vector.shape_cast %120 : vector<1x1x32xf32> to vector<1x32xf32>
    %c0_49 = arith.constant 0 : index
    %c0_50 = arith.constant 0 : index
    %c0_51 = arith.constant 0 : index
    %122 = vector.load %arg10[%c0_49, %c0_50, %c0_51] : memref<2x1x32xf32, #tpu.memory_space<vmem>>, vector<1x1x32xf32>
    %123 = vector.shape_cast %122 : vector<1x1x32xf32> to vector<1x32xf32>
    %cst_52 = arith.constant dense<0.000000e+00> : vector<16xf32>
    %124 = vector.multi_reduction <add>, %119, %cst_52 [1] : vector<16x32xf32> to vector<16xf32>
    %125 = vector.shape_cast %124 : vector<16xf32> to vector<16x1xf32>
    %cst_53 = arith.constant 3.200000e+01 : f32
    %126 = vector.broadcast %cst_53 : f32 to vector<16x1xf32>
    %127 = arith.divf %125, %126 : vector<16x1xf32>
    %128 = vector.broadcast %127 : vector<16x1xf32> to vector<16x32xf32>
    %129 = arith.subf %119, %128 : vector<16x32xf32>
    %130 = arith.mulf %129, %129 : vector<16x32xf32>
    %cst_54 = arith.constant dense<0.000000e+00> : vector<16xf32>
    %131 = vector.multi_reduction <add>, %130, %cst_54 [1] : vector<16x32xf32> to vector<16xf32>
    %132 = vector.shape_cast %131 : vector<16xf32> to vector<16x1xf32>
    %cst_55 = arith.constant 3.200000e+01 : f32
    %133 = vector.broadcast %cst_55 : f32 to vector<16x1xf32>
    %134 = arith.divf %132, %133 : vector<16x1xf32>
    %cst_56 = arith.constant 9.99999996E-13 : f32
    %135 = vector.broadcast %cst_56 : f32 to vector<16x1xf32>
    %136 = arith.addf %134, %135 : vector<16x1xf32>
    %137 = math.rsqrt %136 : vector<16x1xf32>
    %138 = vector.broadcast %137 : vector<16x1xf32> to vector<16x32xf32>
    %139 = arith.mulf %129, %138 : vector<16x32xf32>
    %140 = vector.broadcast %121 : vector<1x32xf32> to vector<16x32xf32>
    %141 = arith.mulf %139, %140 : vector<16x32xf32>
    %142 = vector.broadcast %123 : vector<1x32xf32> to vector<16x32xf32>
    %143 = arith.addf %141, %142 : vector<16x32xf32>
    %144 = arith.truncf %143 : vector<16x32xf32> to vector<16x32xbf16>
    %c0_57 = arith.constant 0 : index
    %c0_58 = arith.constant 0 : index
    %c0_59 = arith.constant 0 : index
    %145 = vector.load %arg11[%c0_57, %c0_58, %c0_59] : memref<2x32x64xbf16, #tpu.memory_space<vmem>>, vector<1x32x64xbf16>
    %146 = vector.shape_cast %145 : vector<1x32x64xbf16> to vector<32x64xbf16>
    %cst_60 = arith.constant dense<0.000000e+00> : vector<16x64xf32>
    %147 = tpu.matmul %144, %146, %cst_60 {dimension_numbers = #tpu.dot_dimension_numbers<[1], [0], [0], [1], [0, 0, 1, 1], [], []>} : vector<16x32xbf16>, vector<32x64xbf16>, vector<16x64xf32> -> vector<16x64xf32>
    %c0_61 = arith.constant 0 : index
    %c0_62 = arith.constant 0 : index
    %c0_63 = arith.constant 0 : index
    %148 = vector.load %arg12[%c0_61, %c0_62, %c0_63] : memref<2x1x64xf32, #tpu.memory_space<vmem>>, vector<1x1x64xf32>
    %149 = vector.shape_cast %148 : vector<1x1x64xf32> to vector<1x64xf32>
    %150 = vector.broadcast %149 : vector<1x64xf32> to vector<16x64xf32>
    %151 = arith.addf %147, %150 : vector<16x64xf32>
    %cst_64 = arith.constant 5.000000e-01 : f32
    %152 = vector.broadcast %cst_64 : f32 to vector<16x64xf32>
    %153 = arith.mulf %152, %151 : vector<16x64xf32>
    %cst_65 = arith.constant 4.471500e-02 : f32
    %154 = vector.broadcast %cst_65 : f32 to vector<16x64xf32>
    %155 = arith.mulf %154, %151 : vector<16x64xf32>
    %156 = arith.mulf %155, %151 : vector<16x64xf32>
    %157 = arith.mulf %156, %151 : vector<16x64xf32>
    %158 = arith.addf %151, %157 : vector<16x64xf32>
    %cst_66 = arith.constant 0.797884583 : f32
    %159 = vector.broadcast %cst_66 : f32 to vector<16x64xf32>
    %160 = arith.mulf %159, %158 : vector<16x64xf32>
    %161 = math.tanh %160 : vector<16x64xf32>
    %cst_67 = arith.constant 1.000000e+00 : f32
    %162 = vector.broadcast %cst_67 : f32 to vector<16x64xf32>
    %163 = arith.addf %162, %161 : vector<16x64xf32>
    %164 = arith.mulf %153, %163 : vector<16x64xf32>
    %165 = arith.truncf %164 : vector<16x64xf32> to vector<16x64xbf16>
    %c0_68 = arith.constant 0 : index
    %c0_69 = arith.constant 0 : index
    %c0_70 = arith.constant 0 : index
    %166 = vector.load %arg13[%c0_68, %c0_69, %c0_70] : memref<2x64x32xbf16, #tpu.memory_space<vmem>>, vector<1x64x32xbf16>
    %167 = vector.shape_cast %166 : vector<1x64x32xbf16> to vector<64x32xbf16>
    %cst_71 = arith.constant dense<0.000000e+00> : vector<16x32xf32>
    %168 = tpu.matmul %165, %167, %cst_71 {dimension_numbers = #tpu.dot_dimension_numbers<[1], [0], [0], [1], [0, 0, 1, 1], [], []>} : vector<16x64xbf16>, vector<64x32xbf16>, vector<16x32xf32> -> vector<16x32xf32>
    %c0_72 = arith.constant 0 : index
    %c0_73 = arith.constant 0 : index
    %c0_74 = arith.constant 0 : index
    %169 = vector.load %arg14[%c0_72, %c0_73, %c0_74] : memref<2x1x32xf32, #tpu.memory_space<vmem>>, vector<1x1x32xf32>
    %170 = vector.shape_cast %169 : vector<1x1x32xf32> to vector<1x32xf32>
    %171 = vector.broadcast %170 : vector<1x32xf32> to vector<16x32xf32>
    %172 = arith.addf %168, %171 : vector<16x32xf32>
    %173 = arith.addf %172, %143 : vector<16x32xf32>
    %c0_75 = arith.constant 0 : index
    %c0_76 = arith.constant 0 : index
    %c0_77 = arith.constant 0 : index
    %174 = vector.load %arg15[%c0_75, %c0_76, %c0_77] : memref<2x1x32xf32, #tpu.memory_space<vmem>>, vector<1x1x32xf32>
    %175 = vector.shape_cast %174 : vector<1x1x32xf32> to vector<1x32xf32>
    %c0_78 = arith.constant 0 : index
    %c0_79 = arith.constant 0 : index
    %c0_80 = arith.constant 0 : index
    %176 = vector.load %arg16[%c0_78, %c0_79, %c0_80] : memref<2x1x32xf32, #tpu.memory_space<vmem>>, vector<1x1x32xf32>
    %177 = vector.shape_cast %176 : vector<1x1x32xf32> to vector<1x32xf32>
    %cst_81 = arith.constant dense<0.000000e+00> : vector<16xf32>
    %178 = vector.multi_reduction <add>, %173, %cst_81 [1] : vector<16x32xf32> to vector<16xf32>
    %179 = vector.shape_cast %178 : vector<16xf32> to vector<16x1xf32>
    %cst_82 = arith.constant 3.200000e+01 : f32
    %180 = vector.broadcast %cst_82 : f32 to vector<16x1xf32>
    %181 = arith.divf %179, %180 : vector<16x1xf32>
    %182 = vector.broadcast %181 : vector<16x1xf32> to vector<16x32xf32>
    %183 = arith.subf %173, %182 : vector<16x32xf32>
    %184 = arith.mulf %183, %183 : vector<16x32xf32>
    %cst_83 = arith.constant dense<0.000000e+00> : vector<16xf32>
    %185 = vector.multi_reduction <add>, %184, %cst_83 [1] : vector<16x32xf32> to vector<16xf32>
    %186 = vector.shape_cast %185 : vector<16xf32> to vector<16x1xf32>
    %cst_84 = arith.constant 3.200000e+01 : f32
    %187 = vector.broadcast %cst_84 : f32 to vector<16x1xf32>
    %188 = arith.divf %186, %187 : vector<16x1xf32>
    %cst_85 = arith.constant 9.99999996E-13 : f32
    %189 = vector.broadcast %cst_85 : f32 to vector<16x1xf32>
    %190 = arith.addf %188, %189 : vector<16x1xf32>
    %191 = math.rsqrt %190 : vector<16x1xf32>
    %192 = vector.broadcast %191 : vector<16x1xf32> to vector<16x32xf32>
    %193 = arith.mulf %183, %192 : vector<16x32xf32>
    %194 = vector.broadcast %175 : vector<1x32xf32> to vector<16x32xf32>
    %195 = arith.mulf %193, %194 : vector<16x32xf32>
    %196 = vector.broadcast %177 : vector<1x32xf32> to vector<16x32xf32>
    %197 = arith.addf %195, %196 : vector<16x32xf32>
    %c1 = arith.constant 1 : index
    %c0_86 = arith.constant 0 : index
    %c0_87 = arith.constant 0 : index
    %198 = vector.load %arg5[%c1, %c0_86, %c0_87] : memref<2x32x96xbf16, #tpu.memory_space<vmem>>, vector<1x32x96xbf16>
    %199 = vector.shape_cast %198 : vector<1x32x96xbf16> to vector<32x96xbf16>
    %c1_88 = arith.constant 1 : index
    %c0_89 = arith.constant 0 : index
    %c0_90 = arith.constant 0 : index
    %200 = vector.load %arg6[%c1_88, %c0_89, %c0_90] : memref<2x1x96xf32, #tpu.memory_space<vmem>>, vector<1x1x96xf32>
    %201 = vector.shape_cast %200 : vector<1x1x96xf32> to vector<1x96xf32>
    %c1_91 = arith.constant 1 : index
    %c0_92 = arith.constant 0 : index
    %c0_93 = arith.constant 0 : index
    %202 = vector.load %arg7[%c1_91, %c0_92, %c0_93] : memref<2x32x32xf32, #tpu.memory_space<vmem>>, vector<1x32x32xf32>
    %203 = vector.shape_cast %202 : vector<1x32x32xf32> to vector<32x32xf32>
    %c1_94 = arith.constant 1 : index
    %c0_95 = arith.constant 0 : index
    %c0_96 = arith.constant 0 : index
    %204 = vector.load %arg8[%c1_94, %c0_95, %c0_96] : memref<2x1x32xf32, #tpu.memory_space<vmem>>, vector<1x1x32xf32>
    %205 = vector.shape_cast %204 : vector<1x1x32xf32> to vector<1x32xf32>
    %206 = arith.truncf %197 : vector<16x32xf32> to vector<16x32xbf16>
    %cst_97 = arith.constant dense<0.000000e+00> : vector<16x96xf32>
    %207 = tpu.matmul %206, %199, %cst_97 {dimension_numbers = #tpu.dot_dimension_numbers<[1], [0], [0], [1], [0, 0, 1, 1], [], []>} : vector<16x32xbf16>, vector<32x96xbf16>, vector<16x96xf32> -> vector<16x96xf32>
    %208 = vector.broadcast %201 : vector<1x96xf32> to vector<16x96xf32>
    %209 = arith.addf %207, %208 : vector<16x96xf32>
    %210 = vector.extract_strided_slice %209 {offsets = [0, 0], sizes = [16, 32], strides = [1, 1]} : vector<16x96xf32> to vector<16x32xf32>
    %211 = vector.extract_strided_slice %209 {offsets = [0, 32], sizes = [16, 32], strides = [1, 1]} : vector<16x96xf32> to vector<16x32xf32>
    %212 = vector.extract_strided_slice %209 {offsets = [0, 64], sizes = [16, 32], strides = [1, 1]} : vector<16x96xf32> to vector<16x32xf32>
    %213 = tpu.transpose %211, [1, 0] : vector<16x32xf32> -> vector<32x16xf32>
    %214 = vector.extract_strided_slice %210 {offsets = [0, 0], sizes = [16, 8], strides = [1, 1]} : vector<16x32xf32> to vector<16x8xf32>
    %215 = vector.extract_strided_slice %212 {offsets = [0, 0], sizes = [16, 8], strides = [1, 1]} : vector<16x32xf32> to vector<16x8xf32>
    %216 = vector.extract_strided_slice %213 {offsets = [0, 0], sizes = [8, 16], strides = [1, 1]} : vector<32x16xf32> to vector<8x16xf32>
    %cst_98 = arith.constant dense<0.000000e+00> : vector<16x16xf32>
    %217 = tpu.matmul %214, %216, %cst_98 {dimension_numbers = #tpu.dot_dimension_numbers<[1], [0], [0], [1], [0, 0, 1, 1], [], []>} : vector<16x8xf32>, vector<8x16xf32>, vector<16x16xf32> -> vector<16x16xf32>
    %218 = arith.addf %217, %25 : vector<16x16xf32>
    %cst_99 = arith.constant dense<0xFF800000> : vector<16xf32>
    %219 = vector.multi_reduction <maximumf>, %218, %cst_99 [1] : vector<16x16xf32> to vector<16xf32>
    %220 = vector.shape_cast %219 : vector<16xf32> to vector<16x1xf32>
    %221 = vector.broadcast %220 : vector<16x1xf32> to vector<16x16xf32>
    %222 = arith.subf %218, %221 : vector<16x16xf32>
    %223 = math.exp %222 : vector<16x16xf32>
    %cst_100 = arith.constant dense<0.000000e+00> : vector<16xf32>
    %224 = vector.multi_reduction <add>, %223, %cst_100 [1] : vector<16x16xf32> to vector<16xf32>
    %225 = vector.shape_cast %224 : vector<16xf32> to vector<16x1xf32>
    %226 = tpu.reciprocal %225 {approx = true} : vector<16x1xf32> -> vector<16x1xf32>
    %227 = vector.broadcast %226 : vector<16x1xf32> to vector<16x16xf32>
    %228 = arith.mulf %223, %227 : vector<16x16xf32>
    %cst_101 = arith.constant dense<0.000000e+00> : vector<16x8xf32>
    %229 = tpu.matmul %228, %215, %cst_101 {dimension_numbers = #tpu.dot_dimension_numbers<[1], [0], [0], [1], [0, 0, 1, 1], [], []>} : vector<16x16xf32>, vector<16x8xf32>, vector<16x8xf32> -> vector<16x8xf32>
    %230 = vector.extract_strided_slice %203 {offsets = [0, 0], sizes = [8, 32], strides = [1, 1]} : vector<32x32xf32> to vector<8x32xf32>
    %cst_102 = arith.constant dense<0.000000e+00> : vector<16x32xf32>
    %231 = tpu.matmul %229, %230, %cst_102 {dimension_numbers = #tpu.dot_dimension_numbers<[1], [0], [0], [1], [0, 0, 1, 1], [], []>} : vector<16x8xf32>, vector<8x32xf32>, vector<16x32xf32> -> vector<16x32xf32>
    %232 = vector.broadcast %205 : vector<1x32xf32> to vector<16x32xf32>
    %233 = arith.addf %232, %231 : vector<16x32xf32>
    %234 = vector.extract_strided_slice %210 {offsets = [0, 8], sizes = [16, 8], strides = [1, 1]} : vector<16x32xf32> to vector<16x8xf32>
    %235 = vector.extract_strided_slice %212 {offsets = [0, 8], sizes = [16, 8], strides = [1, 1]} : vector<16x32xf32> to vector<16x8xf32>
    %236 = vector.extract_strided_slice %213 {offsets = [8, 0], sizes = [8, 16], strides = [1, 1]} : vector<32x16xf32> to vector<8x16xf32>
    %cst_103 = arith.constant dense<0.000000e+00> : vector<16x16xf32>
    %237 = tpu.matmul %234, %236, %cst_103 {dimension_numbers = #tpu.dot_dimension_numbers<[1], [0], [0], [1], [0, 0, 1, 1], [], []>} : vector<16x8xf32>, vector<8x16xf32>, vector<16x16xf32> -> vector<16x16xf32>
    %238 = arith.addf %237, %25 : vector<16x16xf32>
    %cst_104 = arith.constant dense<0xFF800000> : vector<16xf32>
    %239 = vector.multi_reduction <maximumf>, %238, %cst_104 [1] : vector<16x16xf32> to vector<16xf32>
    %240 = vector.shape_cast %239 : vector<16xf32> to vector<16x1xf32>
    %241 = vector.broadcast %240 : vector<16x1xf32> to vector<16x16xf32>
    %242 = arith.subf %238, %241 : vector<16x16xf32>
    %243 = math.exp %242 : vector<16x16xf32>
    %cst_105 = arith.constant dense<0.000000e+00> : vector<16xf32>
    %244 = vector.multi_reduction <add>, %243, %cst_105 [1] : vector<16x16xf32> to vector<16xf32>
    %245 = vector.shape_cast %244 : vector<16xf32> to vector<16x1xf32>
    %246 = tpu.reciprocal %245 {approx = true} : vector<16x1xf32> -> vector<16x1xf32>
    %247 = vector.broadcast %246 : vector<16x1xf32> to vector<16x16xf32>
    %248 = arith.mulf %243, %247 : vector<16x16xf32>
    %cst_106 = arith.constant dense<0.000000e+00> : vector<16x8xf32>
    %249 = tpu.matmul %248, %235, %cst_106 {dimension_numbers = #tpu.dot_dimension_numbers<[1], [0], [0], [1], [0, 0, 1, 1], [], []>} : vector<16x16xf32>, vector<16x8xf32>, vector<16x8xf32> -> vector<16x8xf32>
    %250 = vector.extract_strided_slice %203 {offsets = [8, 0], sizes = [8, 32], strides = [1, 1]} : vector<32x32xf32> to vector<8x32xf32>
    %cst_107 = arith.constant dense<0.000000e+00> : vector<16x32xf32>
    %251 = tpu.matmul %249, %250, %cst_107 {dimension_numbers = #tpu.dot_dimension_numbers<[1], [0], [0], [1], [0, 0, 1, 1], [], []>} : vector<16x8xf32>, vector<8x32xf32>, vector<16x32xf32> -> vector<16x32xf32>
    %252 = arith.addf %233, %251 : vector<16x32xf32>
    %253 = vector.extract_strided_slice %210 {offsets = [0, 16], sizes = [16, 8], strides = [1, 1]} : vector<16x32xf32> to vector<16x8xf32>
    %254 = vector.extract_strided_slice %212 {offsets = [0, 16], sizes = [16, 8], strides = [1, 1]} : vector<16x32xf32> to vector<16x8xf32>
    %255 = vector.extract_strided_slice %213 {offsets = [16, 0], sizes = [8, 16], strides = [1, 1]} : vector<32x16xf32> to vector<8x16xf32>
    %cst_108 = arith.constant dense<0.000000e+00> : vector<16x16xf32>
    %256 = tpu.matmul %253, %255, %cst_108 {dimension_numbers = #tpu.dot_dimension_numbers<[1], [0], [0], [1], [0, 0, 1, 1], [], []>} : vector<16x8xf32>, vector<8x16xf32>, vector<16x16xf32> -> vector<16x16xf32>
    %257 = arith.addf %256, %25 : vector<16x16xf32>
    %cst_109 = arith.constant dense<0xFF800000> : vector<16xf32>
    %258 = vector.multi_reduction <maximumf>, %257, %cst_109 [1] : vector<16x16xf32> to vector<16xf32>
    %259 = vector.shape_cast %258 : vector<16xf32> to vector<16x1xf32>
    %260 = vector.broadcast %259 : vector<16x1xf32> to vector<16x16xf32>
    %261 = arith.subf %257, %260 : vector<16x16xf32>
    %262 = math.exp %261 : vector<16x16xf32>
    %cst_110 = arith.constant dense<0.000000e+00> : vector<16xf32>
    %263 = vector.multi_reduction <add>, %262, %cst_110 [1] : vector<16x16xf32> to vector<16xf32>
    %264 = vector.shape_cast %263 : vector<16xf32> to vector<16x1xf32>
    %265 = tpu.reciprocal %264 {approx = true} : vector<16x1xf32> -> vector<16x1xf32>
    %266 = vector.broadcast %265 : vector<16x1xf32> to vector<16x16xf32>
    %267 = arith.mulf %262, %266 : vector<16x16xf32>
    %cst_111 = arith.constant dense<0.000000e+00> : vector<16x8xf32>
    %268 = tpu.matmul %267, %254, %cst_111 {dimension_numbers = #tpu.dot_dimension_numbers<[1], [0], [0], [1], [0, 0, 1, 1], [], []>} : vector<16x16xf32>, vector<16x8xf32>, vector<16x8xf32> -> vector<16x8xf32>
    %269 = vector.extract_strided_slice %203 {offsets = [16, 0], sizes = [8, 32], strides = [1, 1]} : vector<32x32xf32> to vector<8x32xf32>
    %cst_112 = arith.constant dense<0.000000e+00> : vector<16x32xf32>
    %270 = tpu.matmul %268, %269, %cst_112 {dimension_numbers = #tpu.dot_dimension_numbers<[1], [0], [0], [1], [0, 0, 1, 1], [], []>} : vector<16x8xf32>, vector<8x32xf32>, vector<16x32xf32> -> vector<16x32xf32>
    %271 = arith.addf %252, %270 : vector<16x32xf32>
    %272 = vector.extract_strided_slice %210 {offsets = [0, 24], sizes = [16, 8], strides = [1, 1]} : vector<16x32xf32> to vector<16x8xf32>
    %273 = vector.extract_strided_slice %212 {offsets = [0, 24], sizes = [16, 8], strides = [1, 1]} : vector<16x32xf32> to vector<16x8xf32>
    %274 = vector.extract_strided_slice %213 {offsets = [24, 0], sizes = [8, 16], strides = [1, 1]} : vector<32x16xf32> to vector<8x16xf32>
    %cst_113 = arith.constant dense<0.000000e+00> : vector<16x16xf32>
    %275 = tpu.matmul %272, %274, %cst_113 {dimension_numbers = #tpu.dot_dimension_numbers<[1], [0], [0], [1], [0, 0, 1, 1], [], []>} : vector<16x8xf32>, vector<8x16xf32>, vector<16x16xf32> -> vector<16x16xf32>
    %276 = arith.addf %275, %25 : vector<16x16xf32>
    %cst_114 = arith.constant dense<0xFF800000> : vector<16xf32>
    %277 = vector.multi_reduction <maximumf>, %276, %cst_114 [1] : vector<16x16xf32> to vector<16xf32>
    %278 = vector.shape_cast %277 : vector<16xf32> to vector<16x1xf32>
    %279 = vector.broadcast %278 : vector<16x1xf32> to vector<16x16xf32>
    %280 = arith.subf %276, %279 : vector<16x16xf32>
    %281 = math.exp %280 : vector<16x16xf32>
    %cst_115 = arith.constant dense<0.000000e+00> : vector<16xf32>
    %282 = vector.multi_reduction <add>, %281, %cst_115 [1] : vector<16x16xf32> to vector<16xf32>
    %283 = vector.shape_cast %282 : vector<16xf32> to vector<16x1xf32>
    %284 = tpu.reciprocal %283 {approx = true} : vector<16x1xf32> -> vector<16x1xf32>
    %285 = vector.broadcast %284 : vector<16x1xf32> to vector<16x16xf32>
    %286 = arith.mulf %281, %285 : vector<16x16xf32>
    %cst_116 = arith.constant dense<0.000000e+00> : vector<16x8xf32>
    %287 = tpu.matmul %286, %273, %cst_116 {dimension_numbers = #tpu.dot_dimension_numbers<[1], [0], [0], [1], [0, 0, 1, 1], [], []>} : vector<16x16xf32>, vector<16x8xf32>, vector<16x8xf32> -> vector<16x8xf32>
    %288 = vector.extract_strided_slice %203 {offsets = [24, 0], sizes = [8, 32], strides = [1, 1]} : vector<32x32xf32> to vector<8x32xf32>
    %cst_117 = arith.constant dense<0.000000e+00> : vector<16x32xf32>
    %289 = tpu.matmul %287, %288, %cst_117 {dimension_numbers = #tpu.dot_dimension_numbers<[1], [0], [0], [1], [0, 0, 1, 1], [], []>} : vector<16x8xf32>, vector<8x32xf32>, vector<16x32xf32> -> vector<16x32xf32>
    %290 = arith.addf %271, %289 : vector<16x32xf32>
    %291 = arith.addf %290, %197 : vector<16x32xf32>
    %c1_118 = arith.constant 1 : index
    %c0_119 = arith.constant 0 : index
    %c0_120 = arith.constant 0 : index
    %292 = vector.load %arg9[%c1_118, %c0_119, %c0_120] : memref<2x1x32xf32, #tpu.memory_space<vmem>>, vector<1x1x32xf32>
    %293 = vector.shape_cast %292 : vector<1x1x32xf32> to vector<1x32xf32>
    %c1_121 = arith.constant 1 : index
    %c0_122 = arith.constant 0 : index
    %c0_123 = arith.constant 0 : index
    %294 = vector.load %arg10[%c1_121, %c0_122, %c0_123] : memref<2x1x32xf32, #tpu.memory_space<vmem>>, vector<1x1x32xf32>
    %295 = vector.shape_cast %294 : vector<1x1x32xf32> to vector<1x32xf32>
    %cst_124 = arith.constant dense<0.000000e+00> : vector<16xf32>
    %296 = vector.multi_reduction <add>, %291, %cst_124 [1] : vector<16x32xf32> to vector<16xf32>
    %297 = vector.shape_cast %296 : vector<16xf32> to vector<16x1xf32>
    %cst_125 = arith.constant 3.200000e+01 : f32
    %298 = vector.broadcast %cst_125 : f32 to vector<16x1xf32>
    %299 = arith.divf %297, %298 : vector<16x1xf32>
    %300 = vector.broadcast %299 : vector<16x1xf32> to vector<16x32xf32>
    %301 = arith.subf %291, %300 : vector<16x32xf32>
    %302 = arith.mulf %301, %301 : vector<16x32xf32>
    %cst_126 = arith.constant dense<0.000000e+00> : vector<16xf32>
    %303 = vector.multi_reduction <add>, %302, %cst_126 [1] : vector<16x32xf32> to vector<16xf32>
    %304 = vector.shape_cast %303 : vector<16xf32> to vector<16x1xf32>
    %cst_127 = arith.constant 3.200000e+01 : f32
    %305 = vector.broadcast %cst_127 : f32 to vector<16x1xf32>
    %306 = arith.divf %304, %305 : vector<16x1xf32>
    %cst_128 = arith.constant 9.99999996E-13 : f32
    %307 = vector.broadcast %cst_128 : f32 to vector<16x1xf32>
    %308 = arith.addf %306, %307 : vector<16x1xf32>
    %309 = math.rsqrt %308 : vector<16x1xf32>
    %310 = vector.broadcast %309 : vector<16x1xf32> to vector<16x32xf32>
    %311 = arith.mulf %301, %310 : vector<16x32xf32>
    %312 = vector.broadcast %293 : vector<1x32xf32> to vector<16x32xf32>
    %313 = arith.mulf %311, %312 : vector<16x32xf32>
    %314 = vector.broadcast %295 : vector<1x32xf32> to vector<16x32xf32>
    %315 = arith.addf %313, %314 : vector<16x32xf32>
    %316 = arith.truncf %315 : vector<16x32xf32> to vector<16x32xbf16>
    %c1_129 = arith.constant 1 : index
    %c0_130 = arith.constant 0 : index
    %c0_131 = arith.constant 0 : index
    %317 = vector.load %arg11[%c1_129, %c0_130, %c0_131] : memref<2x32x64xbf16, #tpu.memory_space<vmem>>, vector<1x32x64xbf16>
    %318 = vector.shape_cast %317 : vector<1x32x64xbf16> to vector<32x64xbf16>
    %cst_132 = arith.constant dense<0.000000e+00> : vector<16x64xf32>
    %319 = tpu.matmul %316, %318, %cst_132 {dimension_numbers = #tpu.dot_dimension_numbers<[1], [0], [0], [1], [0, 0, 1, 1], [], []>} : vector<16x32xbf16>, vector<32x64xbf16>, vector<16x64xf32> -> vector<16x64xf32>
    %c1_133 = arith.constant 1 : index
    %c0_134 = arith.constant 0 : index
    %c0_135 = arith.constant 0 : index
    %320 = vector.load %arg12[%c1_133, %c0_134, %c0_135] : memref<2x1x64xf32, #tpu.memory_space<vmem>>, vector<1x1x64xf32>
    %321 = vector.shape_cast %320 : vector<1x1x64xf32> to vector<1x64xf32>
    %322 = vector.broadcast %321 : vector<1x64xf32> to vector<16x64xf32>
    %323 = arith.addf %319, %322 : vector<16x64xf32>
    %cst_136 = arith.constant 5.000000e-01 : f32
    %324 = vector.broadcast %cst_136 : f32 to vector<16x64xf32>
    %325 = arith.mulf %324, %323 : vector<16x64xf32>
    %cst_137 = arith.constant 4.471500e-02 : f32
    %326 = vector.broadcast %cst_137 : f32 to vector<16x64xf32>
    %327 = arith.mulf %326, %323 : vector<16x64xf32>
    %328 = arith.mulf %327, %323 : vector<16x64xf32>
    %329 = arith.mulf %328, %323 : vector<16x64xf32>
    %330 = arith.addf %323, %329 : vector<16x64xf32>
    %cst_138 = arith.constant 0.797884583 : f32
    %331 = vector.broadcast %cst_138 : f32 to vector<16x64xf32>
    %332 = arith.mulf %331, %330 : vector<16x64xf32>
    %333 = math.tanh %332 : vector<16x64xf32>
    %cst_139 = arith.constant 1.000000e+00 : f32
    %334 = vector.broadcast %cst_139 : f32 to vector<16x64xf32>
    %335 = arith.addf %334, %333 : vector<16x64xf32>
    %336 = arith.mulf %325, %335 : vector<16x64xf32>
    %337 = arith.truncf %336 : vector<16x64xf32> to vector<16x64xbf16>
    %c1_140 = arith.constant 1 : index
    %c0_141 = arith.constant 0 : index
    %c0_142 = arith.constant 0 : index
    %338 = vector.load %arg13[%c1_140, %c0_141, %c0_142] : memref<2x64x32xbf16, #tpu.memory_space<vmem>>, vector<1x64x32xbf16>
    %339 = vector.shape_cast %338 : vector<1x64x32xbf16> to vector<64x32xbf16>
    %cst_143 = arith.constant dense<0.000000e+00> : vector<16x32xf32>
    %340 = tpu.matmul %337, %339, %cst_143 {dimension_numbers = #tpu.dot_dimension_numbers<[1], [0], [0], [1], [0, 0, 1, 1], [], []>} : vector<16x64xbf16>, vector<64x32xbf16>, vector<16x32xf32> -> vector<16x32xf32>
    %c1_144 = arith.constant 1 : index
    %c0_145 = arith.constant 0 : index
    %c0_146 = arith.constant 0 : index
    %341 = vector.load %arg14[%c1_144, %c0_145, %c0_146] : memref<2x1x32xf32, #tpu.memory_space<vmem>>, vector<1x1x32xf32>
    %342 = vector.shape_cast %341 : vector<1x1x32xf32> to vector<1x32xf32>
    %343 = vector.broadcast %342 : vector<1x32xf32> to vector<16x32xf32>
    %344 = arith.addf %340, %343 : vector<16x32xf32>
    %345 = arith.addf %344, %315 : vector<16x32xf32>
    %c1_147 = arith.constant 1 : index
    %c0_148 = arith.constant 0 : index
    %c0_149 = arith.constant 0 : index
    %346 = vector.load %arg15[%c1_147, %c0_148, %c0_149] : memref<2x1x32xf32, #tpu.memory_space<vmem>>, vector<1x1x32xf32>
    %347 = vector.shape_cast %346 : vector<1x1x32xf32> to vector<1x32xf32>
    %c1_150 = arith.constant 1 : index
    %c0_151 = arith.constant 0 : index
    %c0_152 = arith.constant 0 : index
    %348 = vector.load %arg16[%c1_150, %c0_151, %c0_152] : memref<2x1x32xf32, #tpu.memory_space<vmem>>, vector<1x1x32xf32>
    %349 = vector.shape_cast %348 : vector<1x1x32xf32> to vector<1x32xf32>
    %cst_153 = arith.constant dense<0.000000e+00> : vector<16xf32>
    %350 = vector.multi_reduction <add>, %345, %cst_153 [1] : vector<16x32xf32> to vector<16xf32>
    %351 = vector.shape_cast %350 : vector<16xf32> to vector<16x1xf32>
    %cst_154 = arith.constant 3.200000e+01 : f32
    %352 = vector.broadcast %cst_154 : f32 to vector<16x1xf32>
    %353 = arith.divf %351, %352 : vector<16x1xf32>
    %354 = vector.broadcast %353 : vector<16x1xf32> to vector<16x32xf32>
    %355 = arith.subf %345, %354 : vector<16x32xf32>
    %356 = arith.mulf %355, %355 : vector<16x32xf32>
    %cst_155 = arith.constant dense<0.000000e+00> : vector<16xf32>
    %357 = vector.multi_reduction <add>, %356, %cst_155 [1] : vector<16x32xf32> to vector<16xf32>
    %358 = vector.shape_cast %357 : vector<16xf32> to vector<16x1xf32>
    %cst_156 = arith.constant 3.200000e+01 : f32
    %359 = vector.broadcast %cst_156 : f32 to vector<16x1xf32>
    %360 = arith.divf %358, %359 : vector<16x1xf32>
    %cst_157 = arith.constant 9.99999996E-13 : f32
    %361 = vector.broadcast %cst_157 : f32 to vector<16x1xf32>
    %362 = arith.addf %360, %361 : vector<16x1xf32>
    %363 = math.rsqrt %362 : vector<16x1xf32>
    %364 = vector.broadcast %363 : vector<16x1xf32> to vector<16x32xf32>
    %365 = arith.mulf %355, %364 : vector<16x32xf32>
    %366 = vector.broadcast %347 : vector<1x32xf32> to vector<16x32xf32>
    %367 = arith.mulf %365, %366 : vector<16x32xf32>
    %368 = vector.broadcast %349 : vector<1x32xf32> to vector<16x32xf32>
    %369 = arith.addf %367, %368 : vector<16x32xf32>
    %370 = vector.extract_strided_slice %369 {offsets = [0, 0], sizes = [1, 32], strides = [1, 1]} : vector<16x32xf32> to vector<1x32xf32>
    %371 = vector.extract_strided_slice %369 {offsets = [8, 0], sizes = [1, 32], strides = [1, 1]} : vector<16x32xf32> to vector<1x32xf32>
    %372 = tpu.concatenate %370, %371 in 0 : vector<1x32xf32>, vector<1x32xf32> -> vector<2x32xf32>
    %c0_158 = arith.constant 0 : index
    %c0_159 = arith.constant 0 : index
    %373 = vector.load %arg17[%c0_158, %c0_159] : memref<32x32xf32, #tpu.memory_space<vmem>>, vector<32x32xf32>
    %cst_160 = arith.constant dense<0.000000e+00> : vector<2x32xf32>
    %374 = tpu.matmul %372, %373, %cst_160 {dimension_numbers = #tpu.dot_dimension_numbers<[1], [0], [0], [1], [0, 0, 1, 1], [], []>} : vector<2x32xf32>, vector<32x32xf32>, vector<2x32xf32> -> vector<2x32xf32>
    %c0_161 = arith.constant 0 : index
    %c0_162 = arith.constant 0 : index
    %375 = vector.load %arg18[%c0_161, %c0_162] : memref<1x32xf32, #tpu.memory_space<vmem>>, vector<1x32xf32>
    %376 = vector.broadcast %375 : vector<1x32xf32> to vector<2x32xf32>
    %377 = arith.addf %374, %376 : vector<2x32xf32>
    %378 = math.tanh %377 : vector<2x32xf32>
    %c0_163 = arith.constant 0 : index
    %c0_164 = arith.constant 0 : index
    %379 = vector.load %arg19[%c0_163, %c0_164] : memref<32x128xf32, #tpu.memory_space<vmem>>, vector<32x128xf32>
    %cst_165 = arith.constant dense<0.000000e+00> : vector<2x128xf32>
    %380 = tpu.matmul %378, %379, %cst_165 {dimension_numbers = #tpu.dot_dimension_numbers<[1], [0], [0], [1], [0, 0, 1, 1], [], []>} : vector<2x32xf32>, vector<32x128xf32>, vector<2x128xf32> -> vector<2x128xf32>
    %c0_166 = arith.constant 0 : index
    %c0_167 = arith.constant 0 : index
    %381 = vector.load %arg20[%c0_166, %c0_167] : memref<1x128xf32, #tpu.memory_space<vmem>>, vector<1x128xf32>
    %382 = vector.broadcast %381 : vector<1x128xf32> to vector<2x128xf32>
    %383 = arith.addf %380, %382 : vector<2x128xf32>
    %c0_168 = arith.constant 0 : index
    %c0_169 = arith.constant 0 : index
    %c0_170 = arith.constant 0 : index
    %384 = vector.load %arg21[%c0_168, %c0_169, %c0_170] : memref<1x2x128xf32, #tpu.memory_space<vmem>>, vector<1x2x128xf32>
    %385 = vector.shape_cast %384 : vector<1x2x128xf32> to vector<2x128xf32>
    %386 = vector.shape_cast %383 : vector<2x128xf32> to vector<1x2x128xf32>
    tpu.vector_store %arg21[%c0_168, %c0_169, %c0_170], %386 {strides = array<i32>} : memref<1x2x128xf32, #tpu.memory_space<vmem>>, vector<1x2x128xf32>,
    return
  }
  func.func @transform_0(%arg0: i32) -> (i32, i32, i32) {
    %c0_i32 = arith.constant 0 : i32
    %c0_i32_0 = arith.constant 0 : i32
    %c0_i32_1 = arith.constant 0 : i32
    return %arg0, %c0_i32, %c0_i32_0 : i32, i32, i32
  }
  func.func @transform_1(%arg0: i32) -> (i32, i32, i32) {
    %c0_i32 = arith.constant 0 : i32
    %c0_i32_0 = arith.constant 0 : i32
    %c0_i32_1 = arith.constant 0 : i32
    return %arg0, %c0_i32, %c0_i32_0 : i32, i32, i32
  }
  func.func @transform_2(%arg0: i32) -> (i32, i32) {
    %c0_i32 = arith.constant 0 : i32
    %c0_i32_0 = arith.constant 0 : i32
    %c0_i32_1 = arith.constant 0 : i32
    return %c0_i32, %c0_i32_0 : i32, i32
  }
  func.func @transform_3(%arg0: i32) -> (i32, i32) {
    %c0_i32 = arith.constant 0 : i32
    %c0_i32_0 = arith.constant 0 : i32
    %c0_i32_1 = arith.constant 0 : i32
    return %c0_i32, %c0_i32_0 : i32, i32
  }
  func.func @transform_4(%arg0: i32) -> (i32, i32, i32) {
    %c0_i32 = arith.constant 0 : i32
    %c0_i32_0 = arith.constant 0 : i32
    %c0_i32_1 = arith.constant 0 : i32
    %c0_i32_2 = arith.constant 0 : i32
    return %c0_i32, %c0_i32_0, %c0_i32_1 : i32, i32, i32
  }
  func.func @transform_5(%arg0: i32) -> (i32, i32, i32) {
    %c0_i32 = arith.constant 0 : i32
    %c0_i32_0 = arith.constant 0 : i32
    %c0_i32_1 = arith.constant 0 : i32
    %c0_i32_2 = arith.constant 0 : i32
    return %c0_i32, %c0_i32_0, %c0_i32_1 : i32, i32, i32
  }
  func.func @transform_6(%arg0: i32) -> (i32, i32, i32) {
    %c0_i32 = arith.constant 0 : i32
    %c0_i32_0 = arith.constant 0 : i32
    %c0_i32_1 = arith.constant 0 : i32
    %c0_i32_2 = arith.constant 0 : i32
    return %c0_i32, %c0_i32_0, %c0_i32_1 : i32, i32, i32
  }
  func.func @transform_7(%arg0: i32) -> (i32, i32, i32) {
    %c0_i32 = arith.constant 0 : i32
    %c0_i32_0 = arith.constant 0 : i32
    %c0_i32_1 = arith.constant 0 : i32
    %c0_i32_2 = arith.constant 0 : i32
    return %c0_i32, %c0_i32_0, %c0_i32_1 : i32, i32, i32
  }
  func.func @transform_8(%arg0: i32) -> (i32, i32, i32) {
    %c0_i32 = arith.constant 0 : i32
    %c0_i32_0 = arith.constant 0 : i32
    %c0_i32_1 = arith.constant 0 : i32
    %c0_i32_2 = arith.constant 0 : i32
    return %c0_i32, %c0_i32_0, %c0_i32_1 : i32, i32, i32
  }
  func.func @transform_9(%arg0: i32) -> (i32, i32, i32) {
    %c0_i32 = arith.constant 0 : i32
    %c0_i32_0 = arith.constant 0 : i32
    %c0_i32_1 = arith.constant 0 : i32
    %c0_i32_2 = arith.constant 0 : i32
    return %c0_i32, %c0_i32_0, %c0_i32_1 : i32, i32, i32
  }
  func.func @transform_10(%arg0: i32) -> (i32, i32, i32) {
    %c0_i32 = arith.constant 0 : i32
    %c0_i32_0 = arith.constant 0 : i32
    %c0_i32_1 = arith.constant 0 : i32
    %c0_i32_2 = arith.constant 0 : i32
    return %c0_i32, %c0_i32_0, %c0_i32_1 : i32, i32, i32
  }
  func.func @transform_11(%arg0: i32) -> (i32, i32, i32) {
    %c0_i32 = arith.constant 0 : i32
    %c0_i32_0 = arith.constant 0 : i32
    %c0_i32_1 = arith.constant 0 : i32
    %c0_i32_2 = arith.constant 0 : i32
    return %c0_i32, %c0_i32_0, %c0_i32_1 : i32, i32, i32
  }
  func.func @transform_12(%arg0: i32) -> (i32, i32, i32) {
    %c0_i32 = arith.constant 0 : i32
    %c0_i32_0 = arith.constant 0 : i32
    %c0_i32_1 = arith.constant 0 : i32
    %c0_i32_2 = arith.constant 0 : i32
    return %c0_i32, %c0_i32_0, %c0_i32_1 : i32, i32, i32
  }
  func.func @transform_13(%arg0: i32) -> (i32, i32, i32) {
    %c0_i32 = arith.constant 0 : i32
    %c0_i32_0 = arith.constant 0 : i32
    %c0_i32_1 = arith.constant 0 : i32
    %c0_i32_2 = arith.constant 0 : i32
    return %c0_i32, %c0_i32_0, %c0_i32_1 : i32, i32, i32
  }
  func.func @transform_14(%arg0: i32) -> (i32, i32, i32) {
    %c0_i32 = arith.constant 0 : i32
    %c0_i32_0 = arith.constant 0 : i32
    %c0_i32_1 = arith.constant 0 : i32
    %c0_i32_2 = arith.constant 0 : i32
    return %c0_i32, %c0_i32_0, %c0_i32_1 : i32, i32, i32
  }
  func.func @transform_15(%arg0: i32) -> (i32, i32, i32) {
    %c0_i32 = arith.constant 0 : i32
    %c0_i32_0 = arith.constant 0 : i32
    %c0_i32_1 = arith.constant 0 : i32
    %c0_i32_2 = arith.constant 0 : i32
    return %c0_i32, %c0_i32_0, %c0_i32_1 : i32, i32, i32
  }
  func.func @transform_16(%arg0: i32) -> (i32, i32) {
    %c0_i32 = arith.constant 0 : i32
    %c0_i32_0 = arith.constant 0 : i32
    %c0_i32_1 = arith.constant 0 : i32
    return %c0_i32, %c0_i32_0 : i32, i32
  }
  func.func @transform_17(%arg0: i32) -> (i32, i32) {
    %c0_i32 = arith.constant 0 : i32
    %c0_i32_0 = arith.constant 0 : i32
    %c0_i32_1 = arith.constant 0 : i32
    return %c0_i32, %c0_i32_0 : i32, i32
  }
  func.func @transform_18(%arg0: i32) -> (i32, i32) {
    %c0_i32 = arith.constant 0 : i32
    %c0_i32_0 = arith.constant 0 : i32
    %c0_i32_1 = arith.constant 0 : i32
    return %c0_i32, %c0_i32_0 : i32, i32
  }
  func.func @transform_19(%arg0: i32) -> (i32, i32) {
    %c0_i32 = arith.constant 0 : i32
    %c0_i32_0 = arith.constant 0 : i32
    %c0_i32_1 = arith.constant 0 : i32
    return %c0_i32, %c0_i32_0 : i32, i32
  }
  func.func @transform_20(%arg0: i32) -> (i32, i32, i32) {
    %c0_i32 = arith.constant 0 : i32
    %c0_i32_0 = arith.constant 0 : i32
    %c0_i32_1 = arith.constant 0 : i32
    return %arg0, %c0_i32, %c0_i32_0 : i32, i32, i32
  }
}

</mosaic_0001>

<bundles_post_ra>
// kernel: fused_forward.1
= control target key start
LH: loop header
LB: loop body
LE: loop exit
PB: predicated region body
PF: predicated region fallthrough
CT: control target
= control target key end

     0   :  { %s2751_s0 = inlined_call_operand.vmem [shape: f32[1,16,32], index: 0, kind: input, shape index: {}]   ;;  %s2752_s1 = inlined_call_operand.vmem [shape: f32[1,16,16], index: 1, kind: input, shape index: {}]   ;;  %s2753_s2 = inlined_call_operand.vmem [shape: f32[1,32], index: 2, kind: input, shape index: {}]   ;;  %s2754_s3 = inlined_call_operand.vmem [shape: f32[1,32], index: 3, kind: input, shape index: {}]   ;;  %s2755_s4 = inlined_call_operand.vmem [shape: bf16[2,32,96], index: 4, kind: input, shape index: {}]   ;;  %s2756_s5 = inlined_call_operand.vmem [shape: f32[2,1,96], index: 5, kind: input, shape index: {}]   ;;  %s2757_s6 = inlined_call_operand.vmem [shape: f32[2,32,32], index: 6, kind: input, shape index: {}]   ;;  %s2758_s7 = inlined_call_operand.vmem [shape: f32[2,1,32], index: 7, kind: input, shape index: {}]   ;;  %s2759_s8 = inlined_call_operand.vmem [shape: f32[2,1,32], index: 8, kind: input, shape index: {}]   ;;  %s2760_s9 = inlined_call_operand.vmem [shape: f32[2,1,32], index: 9, kind: input, shape index: {}]   ;;  %s2761_s10 = inlined_call_operand.vmem [shape: bf16[2,32,64], index: 10, kind: input, shape index: {}]   ;;  %s2762_s11 = inlined_call_operand.vmem [shape: f32[2,1,64], index: 11, kind: input, shape index: {}]   ;;  %s2763_s12 = inlined_call_operand.vmem [shape: bf16[2,64,32], index: 12, kind: input, shape index: {}]   ;;  %s2764_s13 = inlined_call_operand.vmem [shape: f32[2,1,32], index: 13, kind: input, shape index: {}]   ;;  %s2765_s14 = inlined_call_operand.vmem [shape: f32[2,1,32], index: 14, kind: input, shape index: {}]   ;;  %s2766_s15 = inlined_call_operand.vmem [shape: f32[2,1,32], index: 15, kind: input, shape index: {}]   ;;  %s2767_s16 = inlined_call_operand.vmem [shape: f32[32,32], index: 16, kind: input, shape index: {}]   ;;  %s2768_s17 = inlined_call_operand.vmem [shape: f32[1,32], index: 17, kind: input, shape index: {}]   ;;  %s2769_s18 = inlined_call_operand.vmem [shape: f32[32,128], index: 18, kind: input, shape index: {}]   ;;  %s2770_s19 = inlined_call_operand.vmem [shape: f32[1,128], index: 19, kind: input, shape index: {}]   ;;  %s2771_s20 = inlined_call_operand.hbm [shape: f32[1,2,128], index: 20, kind: output, shape index: {}]  }
   0x1   :  { %2787 = sst [smem:[#allocation5_spill]] %s2751_s0 }
   0x2   :  { %2788 = sst [smem:[#allocation6_spill]] %s2752_s1 }
   0x3   :  { %2789 = sst [smem:[#allocation7_spill]] %s2753_s2 }
   0x4   :  { %2790 = sst [smem:[#allocation8_spill]] %s2754_s3 }
   0x5   :  { %2791 = sst [smem:[#allocation9_spill]] %s2755_s4 }
   0x6   :  { %s2792_s23 = sld [smem:[#allocation5_spill]]  ;;  %vm71_vm0 = vcmask 261120  }
   0xc   :  { %v67_v0 = vld [vmem:[%s2792_s23] sm:$0xff]  ;;  %v68_v1 = vld [vmem:[%s2792_s23 + $0x8] sm:$0xff] }
   0xd   :  { %v72_v2 = vsel %vm71_vm0, %v67_v0, 0.0  ;;  %v75_v3 = vsel %vm71_vm0, %v68_v1, 0.0 }
   0xe   :  { %73 = vadd.xlane.f32.xlu0 %v72_v2 }
   0xf   :  { %25 = vsyncpa [#allocation3], 0  ;;  %v2168_v4 = vmov 32.0   ;;  %s2793_s26 = sld [smem:[#allocation9_spill]]  ;;  %v2026_v53 = vld [vmem:[%s2756_s5] ss:$0 sm:$0xff] }
  0x10   :  { %2044 = vrcp.f32 %v2168_v4  ;;  %s2794_s30 = sld [smem:[#allocation7_spill]]  ;;  %s2169_s24 = smov 96   ;;  %vm184_vm8 = vcmask 64512   ;;  %vm216_vm9 = vcmask 130048  }
  0x11   :  { %s2795_s1 = sld [smem:[#allocation8_spill]]  ;;  %s2786_s4 = smov 64  }
  0x12   :  { %s2796_s3 = sld [smem:[#allocation6_spill]]  ;;  %s2171_s29 = smov 88  }
  0x13   :  { %s2779_s22 = smov 80   ;;  %s2782_s23 = smov 112  }
  0x14   :  { %s2784_s2 = smov 72   ;;  %s2777_s25 = smov 104  }
  0x15   :  { %v1956_v21 = vld [vmem:[%s2793_s26 + $0x8] sm:$0xff]  ;;  %v1955_v23 = vld [vmem:[%s2793_s26] sm:$0xff]  ;;  %s2776_s27 = smov 48   ;;  %s2775_s28 = smov 40  }
  0x16   :  { %76 = vadd.xlane.f32.xlu0 %v75_v3  ;;  %v2045_v5 = vpop.eup %2044  ;;  %170 = vmatpush.bf16.msra.mxu0 %v1956_v21  ;;  %v2024_v42 = vld [vmem:[%s2794_s30] ss:$0 sm:$0xff]  ;;  %s2172_s30 = smov 120  }
  0x17   :  { %v79_v6 = vmul.f32 32.0, %v2045_v5  ;;  %vm83_vm1 = vweird.f32 %v2045_v5  ;;  %v2025_v47 = vld [vmem:[%s2795_s1] ss:$0 sm:$0xff]  ;;  %s2781_s1 = smov 56  }
  0x18   :  { %v2341_v59 = vld [vmem:[%s2796_s3] sm:$0xff]  ;;  %v2348_v63 = vld [vmem:[%s2796_s3 + $0x8] sm:$0xff] }
  0x19   :  { %v80_v7 = vsub.f32 1.0, %v79_v6 }
  0x1a   :  { %171 = vmatpush.bf16.msra.mxu0 %v1955_v23 }
  0x1b   :  { %v81_v8 = vmul.f32 %v2045_v5, %v80_v7 }
  0x1d   :  { %v82_v9 = vadd.f32 %v2045_v5, %v81_v8 }
  0x1f   :  { %v2294_v10 = vsel %vm83_vm1, %v2045_v5, %v82_v9  ;;  %vm840_vm1 = vcmask 523264  }
  0x81   :  { %v74_v11 = vpop.xlane.xlu0 %73 }
  0x82   :  { %v85_v12 = vmul.f32 %v2294_v10, %v74_v11 }
  0x84   :  { %v87_v13 = vsub.f32 %v67_v0, %v85_v12 }
  0x86   :  { %v89_v14 = vmul.f32 %v87_v13, %v87_v13 }
  0x88   :  { %v91_v15 = vsel %vm71_vm0, %v89_v14, 0.0 }
  0x89   :  { %92 = vadd.xlane.f32.xlu1 %v91_v15  ;;  %v77_v16 = vpop.xlane.xlu0 %76 }
  0x8a   :  { %v86_v17 = vmul.f32 %v2294_v10, %v77_v16 }
  0x8c   :  { %v88_v18 = vsub.f32 %v68_v1, %v86_v17 }
  0x8e   :  { %v90_v19 = vmul.f32 %v88_v18, %v88_v18 }
  0x90   :  { %v94_v20 = vsel %vm71_vm0, %v90_v19, 0.0 }
  0x91   :  { %95 = vadd.xlane.f32.xlu1 %v94_v20 }
  0xfc   :  { %v93_v22 = vpop.xlane.xlu1 %92 }
  0xfd   :  { %v97_v24 = vmul.f32 %v93_v22, %v2294_v10 }
  0xff   :  { %v99_v25 = vadd.f32 1e-12, %v97_v24 }
 0x101   :  { %2046 = vrsqrt.f32 %v99_v25  ;;  %vm107_vm3 = vweird.f32 %v99_v25 }
 0x104   :  { %v96_v26 = vpop.xlane.xlu1 %95 }
 0x105   :  { %v98_v27 = vmul.f32 %v96_v26, %v2294_v10 }
 0x107   :  { %v2047_v28 = vpop.eup %2046  ;;  %v100_v29 = vadd.f32 1e-12, %v98_v27 }
 0x108   :  { %v102_v30 = vmul.f32 %v2047_v28, %v99_v25  ;;  %vm108_vm2 = vweird.f32 %v2047_v28 }
 0x109   :  { %2048 = vrsqrt.f32 %v100_v29  ;;  %vm109_vm4 = vmor %vm107_vm3, %vm108_vm2  ;;  %vm117_vm6 = vweird.f32 %v100_v29 }
 0x10a   :  { %v103_v31 = vmul.f32 %v2047_v28, %v102_v30 }
 0x10c   :  { %v104_v32 = vmul.f32 0.5, %v103_v31 }
 0x10e   :  { %v105_v33 = vsub.f32 1.5, %v104_v32 }
 0x10f   :  { %v2049_v34 = vpop.eup %2048 }
 0x110   :  { %v106_v35 = vmul.f32 %v2047_v28, %v105_v33  ;;  %v112_v36 = vmul.f32 %v2049_v34, %v100_v29  ;;  %vm118_vm5 = vweird.f32 %v2049_v34 }
 0x111   :  { %vm119_vm7 = vmor %vm117_vm6, %vm118_vm5 }
 0x112   :  { %v113_v37 = vmul.f32 %v2049_v34, %v112_v36  ;;  %v110_v38 = vsel %vm109_vm4, %v2047_v28, %v106_v35 }
 0x113   :  { %v121_v41 = vmul.f32 %v110_v38, %v87_v13 }
 0x114   :  { %v114_v39 = vmul.f32 0.5, %v113_v37 }
 0x115   :  { %v126_v46 = vmul.f32 %v2024_v42, %v121_v41 }
 0x116   :  { %v115_v40 = vsub.f32 1.5, %v114_v39 }
 0x117   :  { %v2314_v49 = vadd.f32 %v2025_v47, %v126_v46 }
 0x118   :  { %v116_v43 = vmul.f32 %v2049_v34, %v115_v40 }
 0x11a   :  { %v120_v44 = vsel %vm119_vm7, %v2049_v34, %v116_v43 }
 0x11b   :  { %v122_v45 = vmul.f32 %v120_v44, %v88_v18  ;;  %v140_v18 = vld [vmem:[%s2757_s6] sm:$0xff] }
 0x11c   :  { %295 = vmatpush.msra.mxu3 %v140_v18 }
 0x11d   :  { %v127_v48 = vmul.f32 %v2024_v42, %v122_v45  ;;  %v141_v42 = vld [vmem:[%s2757_s6 + $0x8] sm:$0xff] }
 0x11e   :  { %425 = vmatpush.msrb.mxu0 %v141_v42 }
 0x11f   :  { %v2316_v50 = vadd.f32 %v2025_v47, %v127_v48 }
 0x121   :  { %v145_v51 = vpack.c.bf16 %v2316_v50, %v2314_v49 }
 0x123   :  { %1799 = vmatmul.msk.bf16.vlgmr.msra.gmra.mxu0 %vm71_vm0, %v145_v51 }
 0x1a0   :  { %v173_v52 = vpop.f32.mrf.mxu0 }
 0x1a1   :  { %v2328_v56 = vadd.f32 %v2026_v53, %v173_v52 }
 0x1a8   :  { %v175_v54 = vpop.f32.mrf.mxu0 }
 0x1a9   :  { %v2324_v55 = vadd.f32 %v2026_v53, %v175_v54 }
 0x1ab   :  { %182 = vrot.lane.b32.xlu2 %v2324_v55, %s2169_s24  ;;  %v2354_v3 = vpack.i.bf16 %v2328_v56, %v2324_v55 }
 0x1b3   :  { %180 = vrot.lane.b32.xlu2 %v2328_v56, %s2169_s24 }
 0x205   :  { %v183_v57 = vpop.permute.xlu2 %182 }
 0x206   :  { %1800 = vmatpush.xpose.msk.msra.mxu1 %vm184_vm8, %v183_v57 }
 0x20d   :  { %v181_v58 = vpop.permute.xlu2 %180 }
 0x20e   :  { %1801 = vmatpush.xpose.msk.msra.mxu1 %vm184_vm8, %v181_v58 }
 0x211   :  { %1802 = vmatmul.msk.f32.vlgmr.msra.gmra.mxu1 %vm184_vm8, %v2328_v56 }
 0x219   :  { %1803 = vmatmul.msk.f32.gmra.mxu1 %vm184_vm8, %v2324_v55 }
 0x28e   :  { %v210_v60 = vpop.f32.mrf.mxu1 }
 0x28f   :  { %v211_v61 = vadd.f32 %v210_v60, %v2341_v59 }
 0x291   :  { %v217_v62 = vsel %vm216_vm9, %v211_v61, -inf }
 0x292   :  { %218 = vmax.xlane.f32.xlu0 %v217_v62 }
 0x296   :  { %v213_v0 = vpop.f32.mrf.mxu1 }
 0x297   :  { %v214_v1 = vadd.f32 %v213_v0, %v2348_v63 }
 0x299   :  { %v220_v2 = vsel %vm216_vm9, %v214_v1, -inf }
 0x29a   :  { %221 = vmax.xlane.f32.xlu1 %v220_v2 }
 0x2a6   :  { %1985 = vrot.lane.b32.xlu0 %v2354_v3, %s2786_s4 }
 0x2ae   :  { %312 = vrot.lane.b32.xlu0 %v2328_v56, %s2171_s29 }
 0x2b6   :  { %308 = vrot.lane.b32.xlu0 %v2328_v56, %s2172_s30 }
 0x305   :  { %v219_v4 = vpop.xlane.xlu0 %218 }
 0x306   :  { %v223_v5 = vsub.f32 %v211_v61, %v219_v4 }
 0x308   :  { %v225_v6 = vmul.f32 1.442695, %v223_v5 }
 0x30a   :  { %2050 = vpow2.f32 %v225_v6 }
 0x30d   :  { %v222_v7 = vpop.xlane.xlu1 %221 }
 0x30e   :  { %v224_v8 = vsub.f32 %v214_v1, %v222_v7 }
 0x310   :  { %v2051_v9 = vpop.eup %2050  ;;  %v227_v11 = vmul.f32 1.442695, %v224_v8 }
 0x311   :  { %v229_v12 = vsel %vm216_vm9, %v2051_v9, 0.0 }
 0x312   :  { %2052 = vpow2.f32 %v227_v11  ;;  %230 = vadd.xlane.f32.xlu2 %v229_v12 }
 0x318   :  { %v2053_v13 = vpop.eup %2052  ;;  %v1986_v14 = vpop.permute.xlu0 %1985 }
 0x319   :  { %v232_v15 = vsel %vm216_vm9, %v2053_v13, 0.0  ;;  %v1987_v16 = vunpack.i.l.bf16 %v1986_v14  ;;  %v1988_v17 = vunpack.i.h.bf16 %v1986_v14 }
 0x31a   :  { %233 = vadd.xlane.f32.xlu1 %v232_v15 }
 0x31b   :  { %265 = vmatpush.msra.mxu2 %v1987_v16 }
 0x31d   :  { %266 = vmatpush.msra.mxu2 %v1988_v17  ;;  %v2027_v17 = vld [vmem:[%s2758_s7] ss:$0 sm:$0xff] }
 0x320   :  { %v313_v26 = vpop.permute.xlu0 %312 }
 0x328   :  { %v309_v29 = vpop.permute.xlu0 %308 }
 0x333   :  { %314 = vrot.lane.b32.xlu1 %v2324_v55, %s2171_s29 }
 0x33b   :  { %310 = vrot.lane.b32.xlu1 %v2324_v55, %s2172_s30 }
 0x385   :  { %v231_v19 = vpop.xlane.xlu2 %230 }
 0x386   :  { %2054 = vrcp.f32 %v231_v19 }
 0x38c   :  { %v2055_v20 = vpop.eup %2054 }
 0x38d   :  { %v234_v21 = vpop.xlane.xlu1 %233  ;;  %v237_v22 = vmul.f32 %v2055_v20, %v2051_v9 }
 0x38e   :  { %2056 = vrcp.f32 %v234_v21 }
 0x38f   :  { %1804 = vmatmul.msk.f32.vlgmr.msra.gmra.mxu2 %vm216_vm9, %v237_v22 }
 0x394   :  { %v2057_v23 = vpop.eup %2056 }
 0x395   :  { %v238_v24 = vmul.f32 %v2057_v23, %v2053_v13 }
 0x397   :  { %1805 = vmatmul.msk.f32.gmra.mxu2 %vm216_vm9, %v238_v24 }
 0x3a5   :  { %v315_v25 = vpop.permute.xlu1 %314 }
 0x3a6   :  { %1808 = vmatpush.xpose.msk.msrb.mxu3 %vm184_vm8, %v315_v25 }
 0x3aa   :  { %1809 = vmatpush.xpose.msk.msrb.mxu3 %vm184_vm8, %v313_v26 }
 0x3ad   :  { %v311_v30 = vpop.permute.xlu1 %310 }
 0x412   :  { %v268_v27 = vpop.f32.mrf.mxu2 }
 0x413   :  { %1806 = vmatmul.msk.f32.vlgmr.msra.gmra.mxu3 %vm184_vm8, %v268_v27 }
 0x41a   :  { %v271_v28 = vpop.f32.mrf.mxu2 }
 0x41b   :  { %1807 = vmatmul.msk.f32.gmra.mxu3 %vm184_vm8, %v271_v28 }
 0x423   :  { %1810 = vmatmul.msk.f32.vlgmr.msrb.gmra.mxu3 %vm184_vm8, %v309_v29 }
 0x42b   :  { %1811 = vmatmul.msk.f32.gmra.mxu3 %vm184_vm8, %v311_v30 }
 0x496   :  { %v2379_v31 = vpop.f32.mrf.mxu3 }
 0x497   :  { %v306_v18 = vadd.f32 %v2027_v17, %v2379_v31 }
 0x49e   :  { %v2381_v32 = vpop.f32.mrf.mxu3 }
 0x49f   :  { %v307_v23 = vadd.f32 %v2027_v17, %v2381_v32 }
 0x4a6   :  { %v341_v33 = vpop.f32.mrf.mxu3 }
 0x4a7   :  { %v342_v34 = vadd.f32 %v341_v33, %v2341_v59 }
 0x4a9   :  { %v347_v35 = vsel %vm216_vm9, %v342_v34, -inf }
 0x4aa   :  { %348 = vmax.xlane.f32.xlu2 %v347_v35 }
 0x4ae   :  { %v344_v36 = vpop.f32.mrf.mxu3 }
 0x4af   :  { %v345_v37 = vadd.f32 %v344_v36, %v2348_v63 }
 0x4b1   :  { %v350_v38 = vsel %vm216_vm9, %v345_v37, -inf }
 0x4b2   :  { %351 = vmax.xlane.f32.xlu0 %v350_v38 }
 0x4c2   :  { %1990 = vrot.lane.b32.xlu2 %v2354_v3, %s2781_s1  ;;  %s2801_s1 = smov 80  }
 0x4c6   :  { %441 = vrot.lane.b32.xlu0 %v2324_v55, %s2779_s22 }
 0x4ce   :  { %435 = vrot.lane.b32.xlu0 %v2328_v56, %s2782_s23 }
 0x4d6   :  { %568 = vrot.lane.b32.xlu0 %v2324_v55, %s2784_s2 }
 0x4de   :  { %562 = vrot.lane.b32.xlu0 %v2328_v56, %s2777_s25 }
 0x51d   :  { %v349_v39 = vpop.xlane.xlu2 %348 }
 0x51e   :  { %v353_v40 = vsub.f32 %v342_v34, %v349_v39 }
 0x520   :  { %v355_v41 = vmul.f32 1.442695, %v353_v40 }
 0x522   :  { %2058 = vpow2.f32 %v355_v41 }
 0x525   :  { %v352_v43 = vpop.xlane.xlu0 %351  ;;  %v1991_v44 = vpop.permute.xlu2 %1990 }
 0x526   :  { %v354_v45 = vsub.f32 %v345_v37, %v352_v43  ;;  %v1992_v46 = vunpack.i.l.bf16 %v1991_v44  ;;  %v1993_v51 = vunpack.i.h.bf16 %v1991_v44 }
 0x528   :  { %v2059_v47 = vpop.eup %2058  ;;  %v357_v48 = vmul.f32 1.442695, %v354_v45  ;;  %395 = vmatpush.msrb.mxu2 %v1992_v46 }
 0x529   :  { %v359_v52 = vsel %vm216_vm9, %v2059_v47, 0.0 }
 0x52a   :  { %2060 = vpow2.f32 %v357_v48  ;;  %360 = vadd.xlane.f32.xlu1 %v359_v52  ;;  %396 = vmatpush.msrb.mxu2 %v1993_v51 }
 0x530   :  { %v2061_v53 = vpop.eup %2060 }
 0x531   :  { %v362_v54 = vsel %vm216_vm9, %v2061_v53, 0.0 }
 0x532   :  { %363 = vadd.xlane.f32.xlu2 %v362_v54 }
 0x538   :  { %v442_v57 = vpop.permute.xlu0 %441 }
 0x539   :  { %1816 = vmatpush.xpose.msk.msrb.mxu1 %vm184_vm8, %v442_v57 }
 0x540   :  { %v436_v58 = vpop.permute.xlu0 %435 }
 0x543   :  { %439 = vrot.lane.b32.xlu1 %v2328_v56, %s2779_s22  ;;  %s2802_s22 = smov 104  }
 0x548   :  { %v569_v60 = vpop.permute.xlu0 %568 }
 0x549   :  { %1824 = vmatpush.xpose.msk.msra.mxu0 %vm184_vm8, %v569_v60 }
 0x54a   :  { %566 = vrot.lane.b32.xlu2 %v2328_v56, %s2784_s2 }
 0x54b   :  { %437 = vrot.lane.b32.xlu1 %v2324_v55, %s2782_s23 }
 0x550   :  { %v563_v12 = vpop.permute.xlu0 %562 }
 0x553   :  { %564 = vrot.lane.b32.xlu1 %v2324_v55, %s2777_s25 }
 0x59d   :  { %v361_v61 = vpop.xlane.xlu1 %360 }
 0x59e   :  { %2062 = vrcp.f32 %v361_v61 }
 0x5a4   :  { %v2063_v62 = vpop.eup %2062 }
 0x5a5   :  { %v364_v0 = vpop.xlane.xlu2 %363  ;;  %v367_v1 = vmul.f32 %v2063_v62, %v2059_v47 }
 0x5a6   :  { %2064 = vrcp.f32 %v364_v0 }
 0x5a7   :  { %1812 = vmatmul.msk.f32.vlgmr.msrb.gmra.mxu2 %vm216_vm9, %v367_v1 }
 0x5ac   :  { %v2065_v2 = vpop.eup %2064 }
 0x5ad   :  { %v567_v4 = vpop.permute.xlu2 %566  ;;  %v368_v5 = vmul.f32 %v2065_v2, %v2061_v53 }
 0x5ae   :  { %1825 = vmatpush.xpose.msk.msra.mxu0 %vm184_vm8, %v567_v4  ;;  %v142_v4 = vld [vmem:[%s2757_s6 + $0x10] sm:$0xff] }
 0x5af   :  { %1813 = vmatmul.msk.f32.gmra.mxu2 %vm216_vm9, %v368_v5  ;;  %v143_v5 = vld [vmem:[%s2757_s6 + $0x18] sm:$0xff] }
 0x5b0   :  { %552 = vmatpush.msra.mxu2 %v142_v4 }
 0x5b5   :  { %v440_v56 = vpop.permute.xlu1 %439 }
 0x5b6   :  { %1817 = vmatpush.xpose.msk.msrb.mxu1 %vm184_vm8, %v440_v56 }
 0x5b9   :  { %1818 = vmatmul.msk.f32.vlgmr.msrb.gmra.mxu1 %vm184_vm8, %v436_v58 }
 0x5bd   :  { %v438_v55 = vpop.permute.xlu1 %437 }
 0x5c1   :  { %1819 = vmatmul.msk.f32.gmra.mxu1 %vm184_vm8, %v438_v55 }
 0x5c5   :  { %v565_v16 = vpop.permute.xlu1 %564 }
 0x62a   :  { %v398_v6 = vpop.f32.mrf.mxu2 }
 0x62b   :  { %1814 = vmatmul.msk.f32.vlgmr.msrb.gmra.mxu0 %vm184_vm8, %v398_v6 }
 0x632   :  { %v401_v7 = vpop.f32.mrf.mxu2 }
 0x633   :  { %1815 = vmatmul.msk.f32.gmra.mxu0 %vm184_vm8, %v401_v7 }
 0x636   :  { %v468_v8 = vpop.f32.mrf.mxu1 }
 0x637   :  { %v469_v9 = vadd.f32 %v468_v8, %v2341_v59 }
 0x639   :  { %v474_v11 = vsel %vm216_vm9, %v469_v9, -inf }
 0x63a   :  { %475 = vmax.xlane.f32.xlu0 %v474_v11 }
 0x63b   :  { %1826 = vmatmul.msk.f32.vlgmr.msra.gmra.mxu0 %vm184_vm8, %v563_v12 }
 0x63e   :  { %v471_v13 = vpop.f32.mrf.mxu1 }
 0x63f   :  { %v472_v14 = vadd.f32 %v471_v13, %v2348_v63 }
 0x641   :  { %v477_v15 = vsel %vm216_vm9, %v472_v14, -inf }
 0x642   :  { %478 = vmax.xlane.f32.xlu1 %v477_v15 }
 0x643   :  { %1827 = vmatmul.msk.f32.gmra.mxu0 %vm184_vm8, %v565_v16 }
 0x6a8   :  { %v427_v19 = vpop.f32.mrf.mxu0 }
 0x6a9   :  { %v2430_v20 = vadd.f32 %v427_v19, %v306_v18 }
 0x6ad   :  { %v476_v21 = vpop.xlane.xlu0 %475 }
 0x6ae   :  { %v480_v22 = vsub.f32 %v469_v9, %v476_v21 }
 0x6b0   :  { %v482_v24 = vmul.f32 1.442695, %v480_v22  ;;  %v430_v25 = vpop.f32.mrf.mxu0 }
 0x6b1   :  { %v2433_v26 = vadd.f32 %v430_v25, %v307_v23 }
 0x6b2   :  { %2066 = vpow2.f32 %v482_v24 }
 0x6b5   :  { %v479_v27 = vpop.xlane.xlu1 %478 }
 0x6b6   :  { %v481_v31 = vsub.f32 %v472_v14, %v479_v27 }
 0x6b8   :  { %v2067_v28 = vpop.eup %2066  ;;  %v595_v29 = vpop.f32.mrf.mxu0  ;;  %v484_v35 = vmul.f32 1.442695, %v481_v31 }
 0x6b9   :  { %v596_v30 = vadd.f32 %v595_v29, %v2341_v59  ;;  %v486_v33 = vsel %vm216_vm9, %v2067_v28, 0.0 }
 0x6ba   :  { %487 = vadd.xlane.f32.xlu1 %v486_v33  ;;  %2068 = vpow2.f32 %v484_v35 }
 0x6bb   :  { %v601_v34 = vsel %vm216_vm9, %v596_v30, -inf }
 0x6bc   :  { %602 = vmax.xlane.f32.xlu2 %v601_v34 }
 0x6c0   :  { %v598_v36 = vpop.f32.mrf.mxu0  ;;  %v2069_v38 = vpop.eup %2068 }
 0x6c1   :  { %v599_v32 = vadd.f32 %v598_v36, %v2348_v63  ;;  %v489_v39 = vsel %vm216_vm9, %v2069_v38, 0.0 }
 0x6c3   :  { %v604_v37 = vsel %vm216_vm9, %v599_v32, -inf }
 0x6c4   :  { %605 = vmax.xlane.f32.xlu0 %v604_v37 }
 0x6cc   :  { %490 = vadd.xlane.f32.xlu0 %v489_v39 }
 0x6d4   :  { %1995 = vrot.lane.b32.xlu2 %v2354_v3, %s2776_s27 }
 0x6e0   :  { %2000 = vrot.lane.b32.xlu0 %v2354_v3, %s2775_s28 }
 0x72d   :  { %v488_v40 = vpop.xlane.xlu1 %487 }
 0x72e   :  { %2070 = vrcp.f32 %v488_v40 }
 0x72f   :  { %v603_v41 = vpop.xlane.xlu2 %602 }
 0x730   :  { %v607_v42 = vsub.f32 %v596_v30, %v603_v41 }
 0x732   :  { %v609_v43 = vmul.f32 1.442695, %v607_v42 }
 0x734   :  { %2072 = vpow2.f32 %v609_v43  ;;  %v2071_v46 = vpop.eup %2070 }
 0x735   :  { %v494_v54 = vmul.f32 %v2071_v46, %v2067_v28 }
 0x737   :  { %v606_v44 = vpop.xlane.xlu0 %605  ;;  %v1996_v45 = vpop.permute.xlu2 %1995 }
 0x738   :  { %v608_v47 = vsub.f32 %v599_v32, %v606_v44  ;;  %v1997_v48 = vunpack.i.l.bf16 %v1996_v45  ;;  %v1998_v53 = vunpack.i.h.bf16 %v1996_v45 }
 0x73a   :  { %v2073_v51 = vpop.eup %2072  ;;  %v611_v52 = vmul.f32 1.442695, %v608_v47  ;;  %522 = vmatpush.msra.mxu3 %v1997_v48 }
 0x73b   :  { %v613_v57 = vsel %vm216_vm9, %v2073_v51, 0.0 }
 0x73c   :  { %2074 = vpow2.f32 %v611_v52  ;;  %614 = vadd.xlane.f32.xlu1 %v613_v57  ;;  %523 = vmatpush.msra.mxu3 %v1998_v53 }
 0x73d   :  { %1820 = vmatmul.msk.f32.vlgmr.msra.gmra.mxu3 %vm216_vm9, %v494_v54 }
 0x73e   :  { %679 = vmatpush.msrb.mxu3 %v143_v5 }
 0x73f   :  { %v491_v3 = vpop.xlane.xlu0 %490 }
 0x740   :  { %2076 = vrcp.f32 %v491_v3 }
 0x742   :  { %v2075_v58 = vpop.eup %2074 }
 0x743   :  { %v616_v60 = vsel %vm216_vm9, %v2075_v58, 0.0 }
 0x744   :  { %617 = vadd.xlane.f32.xlu1 %v616_v60 }
 0x746   :  { %v2077_v61 = vpop.eup %2076 }
 0x747   :  { %v495_v62 = vmul.f32 %v2077_v61, %v2069_v38  ;;  %v1957_v38 = vld [vmem:[%s2761_s10] sm:$0xff] }
 0x749   :  { %1821 = vmatmul.msk.f32.gmra.mxu3 %vm216_vm9, %v495_v62 }
 0x752   :  { %v2001_v0 = vpop.permute.xlu0 %2000 }
 0x753   :  { %v2002_v1 = vunpack.i.l.bf16 %v2001_v0  ;;  %v2003_v2 = vunpack.i.h.bf16 %v2001_v0  ;;  %v2029_v0 = vld [vmem:[%s2760_s9] ss:$0 sm:$0xff] }
 0x755   :  { %649 = vmatpush.msra.mxu1 %v2002_v1 }
 0x757   :  { %650 = vmatpush.msra.mxu1 %v2003_v2 }
 0x7af   :  { %v615_v56 = vpop.xlane.xlu1 %614 }
 0x7b0   :  { %2078 = vrcp.f32 %v615_v56 }
 0x7b6   :  { %v2079_v55 = vpop.eup %2078 }
 0x7b7   :  { %v621_v6 = vmul.f32 %v2079_v55, %v2073_v51  ;;  %v618_v7 = vpop.xlane.xlu1 %617 }
 0x7b8   :  { %2080 = vrcp.f32 %v618_v7  ;;  %v1961_v7 = vld [vmem:[%s2763_s12 + $0x10] sm:$0xff] }
 0x7b9   :  { %1828 = vmatmul.msk.f32.vlgmr.msra.gmra.mxu1 %vm216_vm9, %v621_v6  ;;  %v1962_v6 = vld [vmem:[%s2763_s12 + $0x18] sm:$0xff] }
 0x7ba   :  { %848 = vmatpush.bf16.msrb.mxu0 %v1962_v6 }
 0x7be   :  { %v2081_v8 = vpop.eup %2080  ;;  %849 = vmatpush.bf16.msrb.mxu0 %v1961_v7 }
 0x7bf   :  { %v622_v9 = vmul.f32 %v2081_v8, %v2075_v58  ;;  %v2028_v58 = vld [vmem:[%s2759_s8] ss:$0 sm:$0xff]  ;;  %v1960_v8 = vld [vmem:[%s2763_s12 + $0x8] sm:$0xff] }
 0x7c0   :  { %v525_v11 = vpop.f32.mrf.mxu3 }
 0x7c1   :  { %1822 = vmatmul.msk.f32.vlgmr.msra.gmra.mxu2 %vm184_vm8, %v525_v11  ;;  %1829 = vmatmul.msk.f32.gmra.mxu1 %vm216_vm9, %v622_v9  ;;  %v1959_v9 = vld [vmem:[%s2763_s12] sm:$0xff] }
 0x7c2   :  { %850 = vmatpush.bf16.msrb.mxu0 %v1960_v8  ;;  %v2030_v11 = vld [vmem:[%s2762_s11] ss:$0 sm:$0xff] }
 0x7c6   :  { %851 = vmatpush.bf16.msrb.mxu0 %v1959_v9 }
 0x7cc   :  { %v528_v12 = vpop.f32.mrf.mxu3 }
 0x7cd   :  { %1823 = vmatmul.msk.f32.gmra.mxu2 %vm184_vm8, %v528_v12 }
 0x836   :  { %v652_v13 = vpop.f32.mrf.mxu1 }
 0x837   :  { %1830 = vmatmul.msk.f32.vlgmr.msrb.gmra.mxu3 %vm184_vm8, %v652_v13 }
 0x83e   :  { %v655_v14 = vpop.f32.mrf.mxu1 }
 0x83f   :  { %1831 = vmatmul.msk.f32.gmra.mxu3 %vm184_vm8, %v655_v14 }
 0x844   :  { %v554_v15 = vpop.f32.mrf.mxu2 }
 0x845   :  { %v560_v16 = vadd.f32 %v554_v15, %v2430_v20 }
 0x850   :  { %v557_v21 = vpop.f32.mrf.mxu2 }
 0x851   :  { %v561_v23 = vadd.f32 %v557_v21, %v2433_v26 }
 0x8ba   :  { %v681_v17 = vpop.f32.mrf.mxu3 }
 0x8bb   :  { %v687_v18 = vadd.f32 %v681_v17, %v560_v16 }
 0x8bd   :  { %v689_v19 = vadd.f32 %v687_v18, %v2314_v49 }
 0x8bf   :  { %v693_v22 = vsel %vm71_vm0, %v689_v19, 0.0 }
 0x8c0   :  { %694 = vadd.xlane.f32.xlu1 %v693_v22 }
 0x8c2   :  { %v684_v24 = vpop.f32.mrf.mxu3 }
 0x8c3   :  { %v688_v25 = vadd.f32 %v684_v24, %v561_v23 }
 0x8c5   :  { %v690_v27 = vadd.f32 %v688_v25, %v2316_v50  ;;  %v1958_v50 = vld [vmem:[%s2761_s10 + $0x8] sm:$0xff] }
 0x8c6   :  { %777 = vmatpush.bf16.msrb.mxu2 %v1958_v50 }
 0x8c7   :  { %v696_v28 = vsel %vm71_vm0, %v690_v27, 0.0 }
 0x8c8   :  { %697 = vadd.xlane.f32.xlu2 %v696_v28 }
 0x8ca   :  { %778 = vmatpush.bf16.msrb.mxu2 %v1957_v38 }
 0x933   :  { %v695_v29 = vpop.xlane.xlu1 %694 }
 0x934   :  { %v699_v20 = vmul.f32 %v695_v29, %v2294_v10 }
 0x936   :  { %v701_v30 = vsub.f32 %v689_v19, %v699_v20 }
 0x938   :  { %v703_v33 = vmul.f32 %v701_v30, %v701_v30 }
 0x93a   :  { %v705_v49 = vsel %vm71_vm0, %v703_v33, 0.0 }
 0x93b   :  { %706 = vadd.xlane.f32.xlu1 %v705_v49  ;;  %v698_v31 = vpop.xlane.xlu2 %697 }
 0x93c   :  { %v700_v34 = vmul.f32 %v698_v31, %v2294_v10 }
 0x93e   :  { %v702_v35 = vsub.f32 %v690_v27, %v700_v34 }
 0x940   :  { %v704_v26 = vmul.f32 %v702_v35, %v702_v35 }
 0x942   :  { %v708_v36 = vsel %vm71_vm0, %v704_v26, 0.0  ;;  %v2031_v26 = vld [vmem:[%s2764_s13] ss:$0 sm:$0xff] }
 0x943   :  { %709 = vadd.xlane.f32.xlu0 %v708_v36 }
 0x9ae   :  { %v707_v32 = vpop.xlane.xlu1 %706 }
 0x9af   :  { %v711_v37 = vmul.f32 %v707_v32, %v2294_v10 }
 0x9b1   :  { %v713_v39 = vadd.f32 1e-12, %v711_v37 }
 0x9b3   :  { %2082 = vrsqrt.f32 %v713_v39  ;;  %vm721_vm11 = vweird.f32 %v713_v39 }
 0x9b6   :  { %v710_v40 = vpop.xlane.xlu0 %709 }
 0x9b7   :  { %v712_v41 = vmul.f32 %v710_v40, %v2294_v10 }
 0x9b9   :  { %v2083_v42 = vpop.eup %2082  ;;  %v714_v43 = vadd.f32 1e-12, %v712_v41 }
 0x9ba   :  { %v716_v44 = vmul.f32 %v2083_v42, %v713_v39  ;;  %vm722_vm10 = vweird.f32 %v2083_v42 }
 0x9bb   :  { %2084 = vrsqrt.f32 %v714_v43  ;;  %vm723_vm12 = vmor %vm721_vm11, %vm722_vm10  ;;  %vm731_vm14 = vweird.f32 %v714_v43 }
 0x9bc   :  { %v717_v45 = vmul.f32 %v2083_v42, %v716_v44 }
 0x9be   :  { %v718_v46 = vmul.f32 0.5, %v717_v45 }
 0x9c0   :  { %v719_v47 = vsub.f32 1.5, %v718_v46 }
 0x9c1   :  { %v2085_v48 = vpop.eup %2084 }
 0x9c2   :  { %v720_v51 = vmul.f32 %v2083_v42, %v719_v47  ;;  %v726_v52 = vmul.f32 %v2085_v48, %v714_v43  ;;  %vm732_vm13 = vweird.f32 %v2085_v48 }
 0x9c3   :  { %vm733_vm15 = vmor %vm731_vm14, %vm732_vm13 }
 0x9c4   :  { %v727_v53 = vmul.f32 %v2085_v48, %v726_v52  ;;  %v724_v54 = vsel %vm723_vm12, %v2083_v42, %v720_v51 }
 0x9c5   :  { %v735_v60 = vmul.f32 %v724_v54, %v701_v30  ;;  %v1964_v54 = vld [vmem:[%s2793_s26 + $0x18] sm:$0xff] }
 0x9c6   :  { %v728_v57 = vmul.f32 0.5, %v727_v53  ;;  %955 = vmatpush.bf16.msrb.mxu1 %v1964_v54 }
 0x9c7   :  { %v740_v1 = vmul.f32 %v2028_v58, %v735_v60 }
 0x9c8   :  { %v729_v3 = vsub.f32 1.5, %v728_v57 }
 0x9c9   :  { %v745_v5 = vadd.f32 %v2029_v0, %v740_v1 }
 0x9ca   :  { %v730_v61 = vmul.f32 %v2085_v48, %v729_v3 }
 0x9cc   :  { %v734_v62 = vsel %vm733_vm15, %v2085_v48, %v730_v61 }
 0x9cd   :  { %v736_v2 = vmul.f32 %v734_v62, %v702_v35 }
 0x9cf   :  { %v741_v4 = vmul.f32 %v2028_v58, %v736_v2  ;;  %v1963_v58 = vld [vmem:[%s2793_s26 + $0x10] sm:$0xff] }
 0x9d0   :  { %956 = vmatpush.bf16.msrb.mxu1 %v1963_v58 }
 0x9d1   :  { %v746_v56 = vadd.f32 %v2029_v0, %v741_v4 }
 0x9d3   :  { %v747_v55 = vpack.c.bf16 %v746_v56, %v745_v5 }
 0x9d5   :  { %1840 = vmatmul.msk.bf16.vlgmr.msrb.gmra.mxu2 %vm71_vm0, %v747_v55 }
 0xa58   :  { %v780_v12 = vpop.f32.mrf.mxu2 }
 0xa59   :  { %v781_v13 = vadd.f32 %v2030_v11, %v780_v12 }
 0xa5b   :  { %v787_v14 = vmul.f32 0.044715, %v781_v13  ;;  %v785_v30 = vmul.f32 0.5, %v781_v13 }
 0xa5d   :  { %v789_v15 = vmul.f32 %v787_v14, %v781_v13 }
 0xa5f   :  { %v791_v16 = vmul.f32 %v789_v15, %v781_v13 }
 0xa60   :  { %v782_v17 = vpop.f32.mrf.mxu2 }
 0xa61   :  { %v793_v18 = vadd.f32 %v791_v16, %v781_v13  ;;  %v783_v19 = vadd.f32 %v2030_v11, %v782_v17  ;;  %v2032_v13 = vld [vmem:[%s2765_s14] ss:$0 sm:$0xff] }
 0xa62   :  { %v2033_v17 = vld [vmem:[%s2766_s15] ss:$0 sm:$0xff] }
 0xa63   :  { %v788_v21 = vmul.f32 0.044715, %v783_v19  ;;  %v795_v22 = vmul.f32 0.7978846, %v793_v18  ;;  %v786_v33 = vmul.f32 0.5, %v783_v19 }
 0xa65   :  { %v790_v23 = vmul.f32 %v788_v21, %v783_v19  ;;  %2086 = vtanh.f32 %v795_v22 }
 0xa67   :  { %v792_v24 = vmul.f32 %v790_v23, %v783_v19 }
 0xa69   :  { %v794_v25 = vadd.f32 %v792_v24, %v783_v19 }
 0xa6b   :  { %v796_v27 = vmul.f32 0.7978846, %v794_v25  ;;  %v2087_v28 = vpop.eup %2086  ;;  %v2034_v25 = vld [vmem:[%s2756_s5 + $0x1] ss:$0 sm:$0xff]  ;;  %s2797_s5 = smov 64  }
 0xa6c   :  { %v799_v29 = vadd.f32 1.0, %v2087_v28 }
 0xa6d   :  { %2088 = vtanh.f32 %v796_v27 }
 0xa6e   :  { %v801_v31 = vmul.f32 %v799_v29, %v785_v30 }
 0xa73   :  { %v2089_v20 = vpop.eup %2088 }
 0xa74   :  { %v800_v49 = vadd.f32 1.0, %v2089_v20 }
 0xa76   :  { %v802_v34 = vmul.f32 %v800_v49, %v786_v33 }
 0xa78   :  { %v803_v35 = vpack.c.bf16 %v802_v34, %v801_v31 }
 0xa7a   :  { %1857 = vmatmul.msk.bf16.vlgmr.msrb.gmra.mxu0 %vm840_vm1, %v803_v35 }
 0xaf7   :  { %v853_v36 = vpop.f32.mrf.mxu0 }
 0xaf8   :  { %v854_v50 = vadd.f32 %v2031_v26, %v853_v36 }
 0xafa   :  { %v858_v32 = vadd.f32 %v854_v50, %v745_v5 }
 0xafc   :  { %v862_v37 = vsel %vm71_vm0, %v858_v32, 0.0 }
 0xafd   :  { %863 = vadd.xlane.f32.xlu1 %v862_v37 }
 0xaff   :  { %v855_v38 = vpop.f32.mrf.mxu0 }
 0xb00   :  { %v856_v39 = vadd.f32 %v2031_v26, %v855_v38 }
 0xb02   :  { %v859_v40 = vadd.f32 %v856_v39, %v746_v56 }
 0xb04   :  { %v865_v41 = vsel %vm71_vm0, %v859_v40, 0.0 }
 0xb05   :  { %866 = vadd.xlane.f32.xlu1 %v865_v41 }
 0xb70   :  { %v864_v42 = vpop.xlane.xlu1 %863 }
 0xb71   :  { %v868_v43 = vmul.f32 %v864_v42, %v2294_v10 }
 0xb73   :  { %v870_v44 = vsub.f32 %v858_v32, %v868_v43 }
 0xb75   :  { %v872_v45 = vmul.f32 %v870_v44, %v870_v44 }
 0xb77   :  { %v874_v46 = vsel %vm71_vm0, %v872_v45, 0.0 }
 0xb78   :  { %875 = vadd.xlane.f32.xlu1 %v874_v46  ;;  %v867_v47 = vpop.xlane.xlu1 %866 }
 0xb79   :  { %v869_v48 = vmul.f32 %v867_v47, %v2294_v10 }
 0xb7b   :  { %v871_v51 = vsub.f32 %v859_v40, %v869_v48 }
 0xb7d   :  { %v873_v52 = vmul.f32 %v871_v51, %v871_v51 }
 0xb7f   :  { %v877_v53 = vsel %vm71_vm0, %v873_v52, 0.0 }
 0xb80   :  { %878 = vadd.xlane.f32.xlu1 %v877_v53 }
 0xbeb   :  { %v876_v57 = vpop.xlane.xlu1 %875 }
 0xbec   :  { %v880_v3 = vmul.f32 %v876_v57, %v2294_v10 }
 0xbee   :  { %v882_v60 = vadd.f32 1e-12, %v880_v3 }
 0xbf0   :  { %2090 = vrsqrt.f32 %v882_v60  ;;  %vm890_vm3 = vweird.f32 %v882_v60 }
 0xbf3   :  { %v879_v61 = vpop.xlane.xlu1 %878 }
 0xbf4   :  { %v881_v62 = vmul.f32 %v879_v61, %v2294_v10 }
 0xbf6   :  { %v2091_v0 = vpop.eup %2090  ;;  %v883_v1 = vadd.f32 1e-12, %v881_v62 }
 0xbf7   :  { %v885_v2 = vmul.f32 %v2091_v0, %v882_v60  ;;  %vm891_vm2 = vweird.f32 %v2091_v0 }
 0xbf8   :  { %2092 = vrsqrt.f32 %v883_v1  ;;  %vm892_vm4 = vmor %vm890_vm3, %vm891_vm2  ;;  %vm900_vm6 = vweird.f32 %v883_v1 }
 0xbf9   :  { %v886_v4 = vmul.f32 %v2091_v0, %v885_v2 }
 0xbfb   :  { %v887_v5 = vmul.f32 0.5, %v886_v4 }
 0xbfd   :  { %v888_v56 = vsub.f32 1.5, %v887_v5 }
 0xbfe   :  { %v2093_v55 = vpop.eup %2092 }
 0xbff   :  { %v889_v6 = vmul.f32 %v2091_v0, %v888_v56  ;;  %v895_v7 = vmul.f32 %v2093_v55, %v883_v1  ;;  %vm901_vm5 = vweird.f32 %v2093_v55 }
 0xc00   :  { %vm902_vm7 = vmor %vm900_vm6, %vm901_vm5  ;;  %vm1709_vm5 = vcmask 1040384  }
 0xc01   :  { %v896_v8 = vmul.f32 %v2093_v55, %v895_v7  ;;  %v893_v9 = vsel %vm892_vm4, %v2091_v0, %v889_v6  ;;  %v1864_v7 = vld [vmem:[%s2757_s6 + $0x28] sm:$0xff] }
 0xc02   :  { %v904_v14 = vmul.f32 %v893_v9, %v870_v44  ;;  %v1863_v9 = vld [vmem:[%s2757_s6 + $0x20] sm:$0xff] }
 0xc03   :  { %v897_v11 = vmul.f32 0.5, %v896_v8  ;;  %1078 = vmatpush.msra.mxu0 %v1863_v9 }
 0xc04   :  { %v909_v18 = vmul.f32 %v2032_v13, %v904_v14 }
 0xc05   :  { %v898_v12 = vsub.f32 1.5, %v897_v11 }
 0xc06   :  { %v2525_v22 = vadd.f32 %v2033_v17, %v909_v18 }
 0xc07   :  { %v899_v15 = vmul.f32 %v2093_v55, %v898_v12 }
 0xc09   :  { %v903_v16 = vsel %vm902_vm7, %v2093_v55, %v899_v15 }
 0xc0a   :  { %v905_v19 = vmul.f32 %v903_v16, %v871_v51 }
 0xc0c   :  { %v910_v21 = vmul.f32 %v2032_v13, %v905_v19 }
 0xc0e   :  { %v2527_v23 = vadd.f32 %v2033_v17, %v910_v21 }
 0xc10   :  { %v930_v24 = vpack.c.bf16 %v2527_v23, %v2525_v22 }
 0xc12   :  { %1876 = vmatmul.msk.bf16.vlgmr.msrb.gmra.mxu1 %vm71_vm0, %v930_v24 }
 0xc8f   :  { %v958_v27 = vpop.f32.mrf.mxu1 }
 0xc90   :  { %v2535_v28 = vadd.f32 %v2034_v25, %v958_v27 }
 0xc92   :  { %965 = vrot.lane.b32.xlu1 %v2535_v28, %s2169_s24 }
 0xc97   :  { %v960_v29 = vpop.f32.mrf.mxu1 }
 0xc98   :  { %v2539_v20 = vadd.f32 %v2034_v25, %v960_v29 }
 0xc9a   :  { %1097 = vrot.lane.b32.xlu0 %v2539_v20, %s2171_s29  ;;  %967 = vrot.lane.b32.xlu2 %v2539_v20, %s2169_s24  ;;  %v2571_v45 = vpack.i.bf16 %v2535_v28, %v2539_v20  ;;  %s2798_s24 = smov 72  }
 0xc9b   :  { %1093 = vrot.lane.b32.xlu1 %v2539_v20, %s2172_s30 }
 0xca2   :  { %1091 = vrot.lane.b32.xlu0 %v2535_v28, %s2172_s30  ;;  %1095 = vrot.lane.b32.xlu2 %v2535_v28, %s2171_s29  ;;  %s2799_s29 = smov 112   ;;  %s2800_s30 = smov 56  }
 0xcf4   :  { %v968_v30 = vpop.permute.xlu2 %967 }
 0xcf5   :  { %1877 = vmatpush.xpose.msk.msra.mxu3 %vm184_vm8, %v968_v30 }
 0xcfc   :  { %v1096_v31 = vpop.permute.xlu2 %1095 }
 0xd04   :  { %v966_v33 = vpop.permute.xlu1 %965 }
 0xd05   :  { %1878 = vmatpush.xpose.msk.msra.mxu3 %vm184_vm8, %v966_v33 }
 0xd08   :  { %1879 = vmatmul.msk.f32.vlgmr.msra.gmra.mxu3 %vm184_vm8, %v2535_v28 }
 0xd0c   :  { %v1098_v49 = vpop.permute.xlu0 %1097 }
 0xd0d   :  { %1885 = vmatpush.xpose.msk.msra.mxu1 %vm184_vm8, %v1098_v49  ;;  %v1094_v35 = vpop.permute.xlu1 %1093 }
 0xd10   :  { %1880 = vmatmul.msk.f32.gmra.mxu3 %vm184_vm8, %v2539_v20 }
 0xd11   :  { %1886 = vmatpush.xpose.msk.msra.mxu1 %vm184_vm8, %v1096_v31 }
 0xd14   :  { %v1092_v34 = vpop.permute.xlu0 %1091 }
 0xd15   :  { %1887 = vmatmul.msk.f32.vlgmr.msra.gmra.mxu1 %vm184_vm8, %v1092_v34 }
 0xd1d   :  { %1888 = vmatmul.msk.f32.gmra.mxu1 %vm184_vm8, %v1094_v35 }
 0xd8b   :  { %v994_v26 = vpop.f32.mrf.mxu3 }
 0xd8c   :  { %v995_v36 = vadd.f32 %v994_v26, %v2341_v59 }
 0xd8e   :  { %v1000_v50 = vsel %vm216_vm9, %v995_v36, -inf }
 0xd8f   :  { %1001 = vmax.xlane.f32.xlu2 %v1000_v50 }
 0xd92   :  { %v1124_v32 = vpop.f32.mrf.mxu1 }
 0xd93   :  { %v1125_v37 = vadd.f32 %v1124_v32, %v2341_v59  ;;  %v997_v38 = vpop.f32.mrf.mxu3 }
 0xd94   :  { %v998_v39 = vadd.f32 %v997_v38, %v2348_v63 }
 0xd95   :  { %v1130_v40 = vsel %vm216_vm9, %v1125_v37, -inf }
 0xd96   :  { %1131 = vmax.xlane.f32.xlu0 %v1130_v40  ;;  %v1003_v41 = vsel %vm216_vm9, %v998_v39, -inf  ;;  %v2140_v40 = vld [vmem:[%s2796_s3] sm:$0xff] }
 0xd97   :  { %1004 = vmax.xlane.f32.xlu1 %v1003_v41 }
 0xd9a   :  { %v1127_v42 = vpop.f32.mrf.mxu1 }
 0xd9b   :  { %v1128_v43 = vadd.f32 %v1127_v42, %v2348_v63 }
 0xd9d   :  { %v1133_v44 = vsel %vm216_vm9, %v1128_v43, -inf }
 0xd9e   :  { %1134 = vmax.xlane.f32.xlu2 %v1133_v44  ;;  %v2141_v44 = vld [vmem:[%s2796_s3 + $0x8] sm:$0xff]  ;;  %s2804_s3 = smov 40  }
 0xdb6   :  { %2005 = vrot.lane.b32.xlu2 %v2571_v45, %s2797_s5 }
 0xdbe   :  { %1351 = vrot.lane.b32.xlu2 %v2539_v20, %s2798_s24 }
 0xdc6   :  { %1349 = vrot.lane.b32.xlu2 %v2535_v28, %s2798_s24  ;;  %s2180_s24 = smov [#allocation2]  }
 0xdce   :  { %1220 = vrot.lane.b32.xlu2 %v2539_v20, %s2799_s29 }
 0xe02   :  { %v1002_v59 = vpop.xlane.xlu2 %1001 }
 0xe03   :  { %v1006_v63 = vsub.f32 %v995_v36, %v1002_v59 }
 0xe05   :  { %v1008_v46 = vmul.f32 1.442695, %v1006_v63 }
 0xe07   :  { %2094 = vpow2.f32 %v1008_v46  ;;  %v2035_v46 = vld [vmem:[%s2758_s7 + $0x1] ss:$0 sm:$0xff]  ;;  %s2803_s7 = smov 48  }
 0xe09   :  { %v1132_v47 = vpop.xlane.xlu0 %1131 }
 0xe0a   :  { %v1136_v48 = vsub.f32 %v1125_v37, %v1132_v47  ;;  %v1005_v51 = vpop.xlane.xlu1 %1004 }
 0xe0b   :  { %v1007_v52 = vsub.f32 %v998_v39, %v1005_v51 }
 0xe0c   :  { %v1138_v53 = vmul.f32 1.442695, %v1136_v48 }
 0xe0d   :  { %v2095_v54 = vpop.eup %2094  ;;  %v1010_v57 = vmul.f32 1.442695, %v1007_v52 }
 0xe0e   :  { %2096 = vpow2.f32 %v1138_v53  ;;  %v1012_v3 = vsel %vm216_vm9, %v2095_v54, 0.0 }
 0xe0f   :  { %2098 = vpow2.f32 %v1010_v57  ;;  %1013 = vadd.xlane.f32.xlu0 %v1012_v3 }
 0xe11   :  { %v1135_v58 = vpop.xlane.xlu2 %1134 }
 0xe12   :  { %v1137_v60 = vsub.f32 %v1128_v43, %v1135_v58 }
 0xe14   :  { %v2097_v61 = vpop.eup %2096  ;;  %v1140_v62 = vmul.f32 1.442695, %v1137_v60 }
 0xe15   :  { %v2099_v0 = vpop.eup %2098  ;;  %v1142_v1 = vsel %vm216_vm9, %v2097_v61, 0.0 }
 0xe16   :  { %2100 = vpow2.f32 %v1140_v62  ;;  %1143 = vadd.xlane.f32.xlu1 %v1142_v1  ;;  %v1015_v2 = vsel %vm216_vm9, %v2099_v0, 0.0 }
 0xe17   :  { %1016 = vadd.xlane.f32.xlu0 %v1015_v2 }
 0xe19   :  { %v2006_v4 = vpop.permute.xlu2 %2005 }
 0xe1a   :  { %v2007_v5 = vunpack.i.l.bf16 %v2006_v4  ;;  %v2008_v55 = vunpack.i.h.bf16 %v2006_v4 }
 0xe1c   :  { %v2101_v56 = vpop.eup %2100  ;;  %1048 = vmatpush.msra.mxu2 %v2007_v5 }
 0xe1d   :  { %v1145_v6 = vsel %vm216_vm9, %v2101_v56, 0.0 }
 0xe1e   :  { %1049 = vmatpush.msra.mxu2 %v2008_v55 }
 0xe1f   :  { %1146 = vadd.xlane.f32.xlu0 %v1145_v6 }
 0xe20   :  { %1208 = vmatpush.msrb.mxu2 %v1864_v7 }
 0xe21   :  { %v1352_v11 = vpop.permute.xlu2 %1351 }
 0xe29   :  { %v1350_v15 = vpop.permute.xlu2 %1349 }
 0xe2f   :  { %2010 = vrot.lane.b32.xlu1 %v2571_v45, %s2800_s30 }
 0xe31   :  { %v1221_v35 = vpop.permute.xlu2 %1220 }
 0xe33   :  { %1224 = vrot.lane.b32.xlu0 %v2539_v20, %s2801_s1 }
 0xe37   :  { %1222 = vrot.lane.b32.xlu1 %v2535_v28, %s2801_s1 }
 0xe3b   :  { %1345 = vrot.lane.b32.xlu0 %v2535_v28, %s2802_s22 }
 0xe3f   :  { %1218 = vrot.lane.b32.xlu1 %v2535_v28, %s2799_s29 }
 0xe47   :  { %1347 = vrot.lane.b32.xlu1 %v2539_v20, %s2802_s22 }
 0xe82   :  { %v1014_v8 = vpop.xlane.xlu0 %1013 }
 0xe83   :  { %2102 = vrcp.f32 %v1014_v8 }
 0xe89   :  { %v2103_v12 = vpop.eup %2102  ;;  %v1144_v18 = vpop.xlane.xlu1 %1143 }
 0xe8a   :  { %v1020_v13 = vmul.f32 %v2103_v12, %v2095_v54  ;;  %v1017_v14 = vpop.xlane.xlu0 %1016 }
 0xe8b   :  { %2104 = vrcp.f32 %v1017_v14 }
 0xe8c   :  { %1881 = vmatmul.msk.f32.vlgmr.msra.gmra.mxu2 %vm216_vm9, %v1020_v13  ;;  %2106 = vrcp.f32 %v1144_v18 }
 0xe8d   :  { %1901 = vmatpush.xpose.msk.msra.mxu2 %vm184_vm8, %v1352_v11 }
 0xe91   :  { %v2105_v16 = vpop.eup %2104  ;;  %1902 = vmatpush.xpose.msk.msra.mxu2 %vm184_vm8, %v1350_v15 }
 0xe92   :  { %v1021_v17 = vmul.f32 %v2105_v16, %v2099_v0  ;;  %v1147_v19 = vpop.xlane.xlu0 %1146  ;;  %v2107_v24 = vpop.eup %2106 }
 0xe93   :  { %2108 = vrcp.f32 %v1147_v19  ;;  %v1150_v28 = vmul.f32 %v2107_v24, %v2097_v61 }
 0xe94   :  { %1882 = vmatmul.msk.f32.gmra.mxu2 %vm216_vm9, %v1021_v17 }
 0xe99   :  { %v2109_v30 = vpop.eup %2108 }
 0xe9a   :  { %v1151_v33 = vmul.f32 %v2109_v30, %v2101_v56 }
 0xea1   :  { %v2011_v21 = vpop.permute.xlu1 %2010 }
 0xea2   :  { %v2012_v25 = vunpack.i.l.bf16 %v2011_v21  ;;  %v2013_v27 = vunpack.i.h.bf16 %v2011_v21 }
 0xea4   :  { %1178 = vmatpush.msrb.mxu3 %v2012_v25 }
 0xea5   :  { %v1225_v29 = vpop.permute.xlu0 %1224 }
 0xea6   :  { %1179 = vmatpush.msrb.mxu3 %v2013_v27  ;;  %1893 = vmatpush.xpose.msk.msrb.mxu0 %vm184_vm8, %v1225_v29 }
 0xea7   :  { %1889 = vmatmul.msk.f32.vlgmr.msrb.gmra.mxu3 %vm216_vm9, %v1150_v28 }
 0xea9   :  { %v1223_v20 = vpop.permute.xlu1 %1222 }
 0xeaa   :  { %1894 = vmatpush.xpose.msk.msrb.mxu0 %vm184_vm8, %v1223_v20 }
 0xead   :  { %v1346_v50 = vpop.permute.xlu0 %1345 }
 0xeaf   :  { %1890 = vmatmul.msk.f32.gmra.mxu3 %vm216_vm9, %v1151_v33 }
 0xeb1   :  { %v1219_v34 = vpop.permute.xlu1 %1218 }
 0xeb9   :  { %v1348_v32 = vpop.permute.xlu1 %1347 }
 0xf0f   :  { %v1051_v49 = vpop.f32.mrf.mxu2 }
 0xf10   :  { %1883 = vmatmul.msk.f32.vlgmr.msra.gmra.mxu0 %vm184_vm8, %v1051_v49 }
 0xf17   :  { %v1054_v31 = vpop.f32.mrf.mxu2 }
 0xf18   :  { %1884 = vmatmul.msk.f32.gmra.mxu0 %vm184_vm8, %v1054_v31 }
 0xf20   :  { %1895 = vmatmul.msk.f32.vlgmr.msrb.gmra.mxu0 %vm184_vm8, %v1219_v34 }
 0xf28   :  { %1896 = vmatmul.msk.f32.gmra.mxu0 %vm184_vm8, %v1221_v35 }
 0xf2a   :  { %v1181_v26 = vpop.f32.mrf.mxu3 }
 0xf2b   :  { %1891 = vmatmul.msk.f32.vlgmr.msrb.gmra.mxu2 %vm184_vm8, %v1181_v26 }
 0xf32   :  { %v1184_v36 = vpop.f32.mrf.mxu3 }
 0xf33   :  { %1892 = vmatmul.msk.f32.gmra.mxu2 %vm184_vm8, %v1184_v36 }
 0xf3b   :  { %1903 = vmatmul.msk.f32.vlgmr.msra.gmra.mxu2 %vm184_vm8, %v1346_v50 }
 0xf43   :  { %1904 = vmatmul.msk.f32.gmra.mxu2 %vm184_vm8, %v1348_v32 }
 0xf8d   :  { %v1080_v37 = vpop.f32.mrf.mxu0 }
 0xf8e   :  { %v1089_v47 = vadd.f32 %v2035_v46, %v1080_v37  ;;  %v1865_v37 = vld [vmem:[%s2757_s6 + $0x30] sm:$0xff] }
 0xf8f   :  { %1335 = vmatpush.msra.mxu3 %v1865_v37  ;;  %v2038_v37 = vld [vmem:[%s2762_s11 + $0x1] ss:$0 sm:$0xff]  ;;  %s1780_s11 = sshll.u32 %s2180_s24, 4  ;;  %s1781_s11 = int_to_ptr.vmem [resolvable:$true] %s1780_s11 }
 0xf95   :  { %v1083_v38 = vpop.f32.mrf.mxu0 }
 0xf96   :  { %v1090_v52 = vadd.f32 %v2035_v46, %v1083_v38  ;;  %v1866_v38 = vld [vmem:[%s2757_s6 + $0x38] sm:$0xff] }
 0xf9d   :  { %v1251_v39 = vpop.f32.mrf.mxu0 }
 0xf9e   :  { %v1252_v41 = vadd.f32 %v2140_v40, %v1251_v39 }
 0xfa0   :  { %v1257_v42 = vsel %vm216_vm9, %v1252_v41, -inf }
 0xfa1   :  { %1258 = vmax.xlane.f32.xlu0 %v1257_v42 }
 0xfa5   :  { %v1254_v43 = vpop.f32.mrf.mxu0 }
 0xfa6   :  { %v1255_v59 = vadd.f32 %v2141_v44, %v1254_v43 }
 0xfa8   :  { %v1260_v63 = vsel %vm216_vm9, %v1255_v59, -inf }
 0xfa9   :  { %1261 = vmax.xlane.f32.xlu2 %v1260_v63 }
 0xfae   :  { %v1210_v48 = vpop.f32.mrf.mxu2 }
 0xfaf   :  { %v2630_v51 = vadd.f32 %v1210_v48, %v1089_v47 }
 0xfb6   :  { %v1213_v53 = vpop.f32.mrf.mxu2 }
 0xfb7   :  { %v2632_v54 = vadd.f32 %v1213_v53, %v1090_v52 }
 0xfbe   :  { %v1378_v57 = vpop.f32.mrf.mxu2 }
 0xfbf   :  { %v1379_v3 = vadd.f32 %v2140_v40, %v1378_v57 }
 0xfc1   :  { %v1384_v58 = vsel %vm216_vm9, %v1379_v3, -inf }
 0xfc2   :  { %1385 = vmax.xlane.f32.xlu1 %v1384_v58 }
 0xfc6   :  { %v1381_v60 = vpop.f32.mrf.mxu2 }
 0xfc7   :  { %v1382_v61 = vadd.f32 %v2141_v44, %v1381_v60 }
 0xfc9   :  { %v1387_v62 = vsel %vm216_vm9, %v1382_v61, -inf }
 0xfca   :  { %1388 = vmax.xlane.f32.xlu0 %v1387_v62 }
 0xfdb   :  { %2015 = vrot.lane.b32.xlu1 %v2571_v45, %s2803_s7 }
0x1014   :  { %v1259_v0 = vpop.xlane.xlu0 %1258 }
0x1015   :  { %v1263_v1 = vsub.f32 %v1252_v41, %v1259_v0 }
0x1017   :  { %v1265_v2 = vmul.f32 1.442695, %v1263_v1 }
0x1019   :  { %2110 = vpow2.f32 %v1265_v2 }
0x101c   :  { %v1262_v4 = vpop.xlane.xlu2 %1261 }
0x101d   :  { %v1264_v5 = vsub.f32 %v1255_v59, %v1262_v4 }
0x101f   :  { %v2111_v56 = vpop.eup %2110  ;;  %v1267_v55 = vmul.f32 1.442695, %v1264_v5 }
0x1020   :  { %v1269_v6 = vsel %vm216_vm9, %v2111_v56, 0.0 }
0x1021   :  { %2112 = vpow2.f32 %v1267_v55  ;;  %1270 = vadd.xlane.f32.xlu2 %v1269_v6  ;;  %v1965_v6 = vld [vmem:[%s2761_s10 + $0x10] sm:$0xff] }
0x1027   :  { %v2113_v7 = vpop.eup %2112 }
0x1028   :  { %v1272_v8 = vsel %vm216_vm9, %v2113_v7, 0.0 }
0x1029   :  { %1273 = vadd.xlane.f32.xlu0 %v1272_v8 }
0x1035   :  { %v1386_v9 = vpop.xlane.xlu1 %1385 }
0x1036   :  { %v1390_v11 = vsub.f32 %v1379_v3, %v1386_v9 }
0x1038   :  { %v1392_v12 = vmul.f32 1.442695, %v1390_v11 }
0x103a   :  { %2114 = vpow2.f32 %v1392_v12 }
0x103d   :  { %2020 = vrot.lane.b32.xlu0 %v2571_v45, %s2804_s3  ;;  %v1389_v13 = vpop.xlane.xlu0 %1388 }
0x103e   :  { %v1391_v14 = vsub.f32 %v1382_v61, %v1389_v13 }
0x1040   :  { %v2115_v15 = vpop.eup %2114  ;;  %v1394_v16 = vmul.f32 1.442695, %v1391_v14 }
0x1041   :  { %v1396_v17 = vsel %vm216_vm9, %v2115_v15, 0.0 }
0x1042   :  { %2116 = vpow2.f32 %v1394_v16  ;;  %1397 = vadd.xlane.f32.xlu2 %v1396_v17 }
0x1048   :  { %v2117_v18 = vpop.eup %2116 }
0x1049   :  { %v1399_v19 = vsel %vm216_vm9, %v2117_v18, 0.0 }
0x104a   :  { %1400 = vadd.xlane.f32.xlu2 %v1399_v19 }
0x104d   :  { %v2016_v21 = vpop.permute.xlu1 %2015 }
0x104e   :  { %v2017_v24 = vunpack.i.l.bf16 %v2016_v21  ;;  %v2018_v25 = vunpack.i.h.bf16 %v2016_v21 }
0x1050   :  { %1305 = vmatpush.msrb.mxu1 %v2017_v24 }
0x1052   :  { %1306 = vmatpush.msrb.mxu1 %v2018_v25 }
0x1054   :  { %1462 = vmatpush.msra.mxu1 %v1866_v38 }
0x1094   :  { %v1271_v27 = vpop.xlane.xlu2 %1270 }
0x1095   :  { %2118 = vrcp.f32 %v1271_v27  ;;  %v2036_v27 = vld [vmem:[%s2759_s8 + $0x1] ss:$0 sm:$0xff] }
0x109b   :  { %v2119_v45 = vpop.eup %2118 }
0x109c   :  { %v1277_v28 = vmul.f32 %v2119_v45, %v2111_v56  ;;  %v1274_v29 = vpop.xlane.xlu0 %1273 }
0x109d   :  { %2120 = vrcp.f32 %v1274_v29 }
0x109e   :  { %1897 = vmatmul.msk.f32.vlgmr.msrb.gmra.mxu1 %vm216_vm9, %v1277_v28 }
0x10a3   :  { %v2121_v20 = vpop.eup %2120 }
0x10a4   :  { %v1278_v30 = vmul.f32 %v2121_v20, %v2113_v7  ;;  %v2037_v20 = vld [vmem:[%s2760_s9 + $0x1] ss:$0 sm:$0xff] }
0x10a6   :  { %1898 = vmatmul.msk.f32.gmra.mxu1 %vm216_vm9, %v1278_v30 }
0x10af   :  { %v2021_v33 = vpop.permute.xlu0 %2020 }
0x10b0   :  { %v2022_v49 = vunpack.i.l.bf16 %v2021_v33  ;;  %v2023_v31 = vunpack.i.h.bf16 %v2021_v33 }
0x10b2   :  { %1432 = vmatpush.msra.mxu0 %v2022_v49 }
0x10b4   :  { %1433 = vmatpush.msra.mxu0 %v2023_v31 }
0x10b5   :  { %v1398_v34 = vpop.xlane.xlu2 %1397 }
0x10b6   :  { %2122 = vrcp.f32 %v1398_v34 }
0x10bc   :  { %v2123_v35 = vpop.eup %2122 }
0x10bd   :  { %v1404_v26 = vmul.f32 %v2123_v35, %v2115_v15  ;;  %v1401_v36 = vpop.xlane.xlu2 %1400 }
0x10be   :  { %2124 = vrcp.f32 %v1401_v36  ;;  %v1969_v36 = vld [vmem:[%s2763_s12 + $0x30] sm:$0xff] }
0x10bf   :  { %1905 = vmatmul.msk.f32.vlgmr.msra.gmra.mxu0 %vm216_vm9, %v1404_v26  ;;  %v1970_v26 = vld [vmem:[%s2763_s12 + $0x38] sm:$0xff] }
0x10c0   :  { %1636 = vmatpush.bf16.msrb.mxu2 %v1970_v26 }
0x10c4   :  { %v2125_v50 = vpop.eup %2124  ;;  %1637 = vmatpush.bf16.msrb.mxu2 %v1969_v36 }
0x10c5   :  { %v1405_v32 = vmul.f32 %v2125_v50, %v2117_v18  ;;  %v1968_v50 = vld [vmem:[%s2763_s12 + $0x28] sm:$0xff] }
0x10c7   :  { %1906 = vmatmul.msk.f32.gmra.mxu0 %vm216_vm9, %v1405_v32  ;;  %v1967_v32 = vld [vmem:[%s2763_s12 + $0x20] sm:$0xff] }
0x10c8   :  { %1638 = vmatpush.bf16.msrb.mxu2 %v1968_v50 }
0x10cc   :  { %1639 = vmatpush.bf16.msrb.mxu2 %v1967_v32 }
0x111b   :  { %v1308_v39 = vpop.f32.mrf.mxu1 }
0x111c   :  { %1899 = vmatmul.msk.f32.vlgmr.msra.gmra.mxu3 %vm184_vm8, %v1308_v39 }
0x1123   :  { %v1311_v40 = vpop.f32.mrf.mxu1 }
0x1124   :  { %1900 = vmatmul.msk.f32.gmra.mxu3 %vm184_vm8, %v1311_v40 }
0x113c   :  { %v1435_v41 = vpop.f32.mrf.mxu0 }
0x113d   :  { %1907 = vmatmul.msk.f32.vlgmr.msra.gmra.mxu1 %vm184_vm8, %v1435_v41 }
0x1144   :  { %v1438_v42 = vpop.f32.mrf.mxu0 }
0x1145   :  { %1908 = vmatmul.msk.f32.gmra.mxu1 %vm184_vm8, %v1438_v42 }
0x119f   :  { %v1337_v43 = vpop.f32.mrf.mxu3 }
0x11a0   :  { %v1343_v44 = vadd.f32 %v1337_v43, %v2630_v51 }
0x11a7   :  { %v1340_v47 = vpop.f32.mrf.mxu3 }
0x11a8   :  { %v1344_v52 = vadd.f32 %v1340_v47, %v2632_v54 }
0x11ba   :  { %v1464_v59 = vpop.f32.mrf.mxu1 }
0x11bb   :  { %v1470_v63 = vadd.f32 %v1464_v59, %v1343_v44 }
0x11bd   :  { %v1472_v46 = vadd.f32 %v1470_v63, %v2525_v22 }
0x11bf   :  { %v1478_v48 = vsel %vm71_vm0, %v1472_v46, 0.0 }
0x11c0   :  { %1479 = vadd.xlane.f32.xlu2 %v1478_v48 }
0x11c2   :  { %v1467_v53 = vpop.f32.mrf.mxu1 }
0x11c3   :  { %v1471_v57 = vadd.f32 %v1467_v53, %v1344_v52 }
0x11c5   :  { %v1473_v3 = vadd.f32 %v1471_v57, %v2527_v23  ;;  %v1966_v23 = vld [vmem:[%s2761_s10 + $0x18] sm:$0xff] }
0x11c6   :  { %1564 = vmatpush.bf16.msrb.mxu3 %v1966_v23 }
0x11c7   :  { %v1481_v58 = vsel %vm71_vm0, %v1473_v3, 0.0 }
0x11c8   :  { %1482 = vadd.xlane.f32.xlu1 %v1481_v58 }
0x11ca   :  { %1565 = vmatpush.bf16.msrb.mxu3 %v1965_v6 }
0x1233   :  { %v1480_v60 = vpop.xlane.xlu2 %1479 }
0x1234   :  { %v1484_v51 = vmul.f32 %v1480_v60, %v2294_v10 }
0x1236   :  { %v1486_v61 = vsub.f32 %v1472_v46, %v1484_v51 }
0x1238   :  { %v1488_v62 = vmul.f32 %v1486_v61, %v1486_v61 }
0x123a   :  { %v1490_v22 = vsel %vm71_vm0, %v1488_v62, 0.0 }
0x123b   :  { %1491 = vadd.xlane.f32.xlu2 %v1490_v22  ;;  %v1483_v0 = vpop.xlane.xlu1 %1482 }
0x123c   :  { %v1485_v1 = vmul.f32 %v1483_v0, %v2294_v10 }
0x123e   :  { %v1487_v2 = vsub.f32 %v1473_v3, %v1485_v1 }
0x1240   :  { %v1489_v54 = vmul.f32 %v1487_v2, %v1487_v2 }
0x1242   :  { %v1493_v4 = vsel %vm71_vm0, %v1489_v54, 0.0 }
0x1243   :  { %1494 = vadd.xlane.f32.xlu0 %v1493_v4 }
0x12ae   :  { %v1492_v5 = vpop.xlane.xlu2 %1491 }
0x12af   :  { %v1496_v56 = vmul.f32 %v1492_v5, %v2294_v10 }
0x12b1   :  { %v1498_v55 = vadd.f32 1e-12, %v1496_v56 }
0x12b3   :  { %2126 = vrsqrt.f32 %v1498_v55  ;;  %vm1506_vm9 = vweird.f32 %v1498_v55 }
0x12b6   :  { %v1495_v7 = vpop.xlane.xlu0 %1494 }
0x12b7   :  { %v1497_v8 = vmul.f32 %v1495_v7, %v2294_v10 }
0x12b9   :  { %v2127_v9 = vpop.eup %2126  ;;  %v1499_v11 = vadd.f32 1e-12, %v1497_v8 }
0x12ba   :  { %v1501_v12 = vmul.f32 %v2127_v9, %v1498_v55  ;;  %vm1507_vm8 = vweird.f32 %v2127_v9 }
0x12bb   :  { %2128 = vrsqrt.f32 %v1499_v11  ;;  %vm1508_vm10 = vmor %vm1506_vm9, %vm1507_vm8  ;;  %vm1516_vm12 = vweird.f32 %v1499_v11 }
0x12bc   :  { %v1502_v13 = vmul.f32 %v2127_v9, %v1501_v12 }
0x12be   :  { %v1503_v14 = vmul.f32 0.5, %v1502_v13 }
0x12c0   :  { %v1504_v15 = vsub.f32 1.5, %v1503_v14 }
0x12c1   :  { %v2129_v16 = vpop.eup %2128 }
0x12c2   :  { %v1505_v17 = vmul.f32 %v2127_v9, %v1504_v15  ;;  %v1511_v18 = vmul.f32 %v2129_v16, %v1499_v11  ;;  %vm1517_vm11 = vweird.f32 %v2129_v16 }
0x12c3   :  { %vm1518_vm13 = vmor %vm1516_vm12, %vm1517_vm11 }
0x12c4   :  { %v1512_v19 = vmul.f32 %v2129_v16, %v1511_v18  ;;  %v1509_v21 = vsel %vm1508_vm10, %v2127_v9, %v1505_v17  ;;  %v1714_v18 = vld [vmem:[%s2767_s16 + $0x18] sm:$0xff] }
0x12c5   :  { %v1520_v45 = vmul.f32 %v1509_v21, %v1486_v61  ;;  %1734 = vmatpush.msrb.mxu0 %v1714_v18 }
0x12c6   :  { %v1513_v24 = vmul.f32 0.5, %v1512_v19 }
0x12c7   :  { %v1525_v30 = vmul.f32 %v2036_v27, %v1520_v45  ;;  %v1711_v45 = vld [vmem:[%s2767_s16] sm:$0xff] }
0x12c8   :  { %v1514_v25 = vsub.f32 1.5, %v1513_v24  ;;  %v1713_v24 = vld [vmem:[%s2767_s16 + $0x10] sm:$0xff] }
0x12c9   :  { %v1530_v31 = vadd.f32 %v2037_v20, %v1525_v30  ;;  %1735 = vmatpush.msrb.mxu0 %v1713_v24 }
0x12ca   :  { %v1515_v28 = vmul.f32 %v2129_v16, %v1514_v25  ;;  %v1712_v25 = vld [vmem:[%s2767_s16 + $0x8] sm:$0xff] }
0x12cb   :  { %1736 = vmatpush.msrb.mxu0 %v1712_v25 }
0x12cc   :  { %v1519_v29 = vsel %vm1518_vm13, %v2129_v16, %v1515_v28 }
0x12cd   :  { %v1521_v33 = vmul.f32 %v1519_v29, %v1487_v2  ;;  %v2039_v2 = vld [vmem:[%s2764_s13 + $0x1] ss:$0 sm:$0xff]  ;;  %1737 = vmatpush.msrb.mxu0 %v1711_v45  ;;  %s1782_s13 = sshll.u32 %s2771_s20, 4  ;;  %s1783_s13 = int_to_ptr.hbm [resolvable:$true] %s1782_s13 }
0x12cf   :  { %v1526_v49 = vmul.f32 %v2036_v27, %v1521_v33 }
0x12d1   :  { %v1531_v34 = vadd.f32 %v2037_v20, %v1526_v49 }
0x12d3   :  { %v1532_v35 = vpack.c.bf16 %v1531_v34, %v1530_v31 }
0x12d5   :  { %1924 = vmatmul.msk.bf16.vlgmr.msrb.gmra.mxu3 %vm71_vm0, %v1532_v35 }
0x1358   :  { %v1567_v38 = vpop.f32.mrf.mxu3 }
0x1359   :  { %v1568_v39 = vadd.f32 %v2038_v37, %v1567_v38 }
0x135b   :  { %v1574_v40 = vmul.f32 0.044715, %v1568_v39  ;;  %v1572_v60 = vmul.f32 0.5, %v1568_v39 }
0x135d   :  { %v1576_v41 = vmul.f32 %v1574_v40, %v1568_v39 }
0x135f   :  { %v1578_v42 = vmul.f32 %v1576_v41, %v1568_v39  ;;  %v2041_v41 = vld [vmem:[%s2766_s15 + $0x1] ss:$0 sm:$0xff] }
0x1360   :  { %v1569_v43 = vpop.f32.mrf.mxu3 }
0x1361   :  { %v1580_v44 = vadd.f32 %v1578_v42, %v1568_v39  ;;  %v1570_v59 = vadd.f32 %v2038_v37, %v1569_v43  ;;  %v2040_v37 = vld [vmem:[%s2765_s14 + $0x1] ss:$0 sm:$0xff] }
0x1363   :  { %v1575_v63 = vmul.f32 0.044715, %v1570_v59  ;;  %v1582_v46 = vmul.f32 0.7978846, %v1580_v44  ;;  %v1573_v51 = vmul.f32 0.5, %v1570_v59 }
0x1365   :  { %v1577_v47 = vmul.f32 %v1575_v63, %v1570_v59  ;;  %2130 = vtanh.f32 %v1582_v46 }
0x1367   :  { %v1579_v48 = vmul.f32 %v1577_v47, %v1570_v59 }
0x1369   :  { %v1581_v52 = vadd.f32 %v1579_v48, %v1570_v59 }
0x136b   :  { %v1583_v53 = vmul.f32 0.7978846, %v1581_v52  ;;  %v2131_v57 = vpop.eup %2130  ;;  %v1746_v52 = vld [vmem:[%s2769_s18 + $0x18] sm:$0xff] }
0x136c   :  { %v1586_v3 = vadd.f32 1.0, %v2131_v57  ;;  %1766 = vmatpush.msrb.mxu1 %v1746_v52  ;;  %v1744_v57 = vld [vmem:[%s2769_s18 + $0x8] sm:$0xff] }
0x136d   :  { %2132 = vtanh.f32 %v1583_v53  ;;  %v1745_v53 = vld [vmem:[%s2769_s18 + $0x10] sm:$0xff] }
0x136e   :  { %v1588_v62 = vmul.f32 %v1586_v3, %v1572_v60  ;;  %1767 = vmatpush.msrb.mxu1 %v1745_v53  ;;  %v1743_v3 = vld [vmem:[%s2769_s18] sm:$0xff] }
0x1370   :  { %1768 = vmatpush.msrb.mxu1 %v1744_v57 }
0x1372   :  { %1769 = vmatpush.msrb.mxu1 %v1743_v3 }
0x1373   :  { %v2133_v58 = vpop.eup %2132 }
0x1374   :  { %v1587_v61 = vadd.f32 1.0, %v2133_v58  ;;  %v2042_v58 = vld [vmem:[%s2768_s17] ss:$0 sm:$0xff] }
0x1376   :  { %v1589_v22 = vmul.f32 %v1587_v61, %v1573_v51 }
0x1378   :  { %v1590_v0 = vpack.c.bf16 %v1589_v22, %v1588_v62  ;;  %v2043_v62 = vld [vmem:[%s2770_s19] ss:$0 sm:$0xff] }
0x137a   :  { %1950 = vmatmul.msk.bf16.vlgmr.msrb.gmra.mxu2 %vm840_vm1, %v1590_v0 }
0x13fd   :  { %v1641_v1 = vpop.f32.mrf.mxu2 }
0x13fe   :  { %v1642_v5 = vadd.f32 %v2039_v2, %v1641_v1 }
0x1400   :  { %v1646_v55 = vadd.f32 %v1642_v5, %v1530_v31 }
0x1402   :  { %v1652_v6 = vsel %vm71_vm0, %v1646_v55, 0.0 }
0x1405   :  { %v1643_v54 = vpop.f32.mrf.mxu2 }
0x1406   :  { %v1644_v4 = vadd.f32 %v2039_v2, %v1643_v54 }
0x1408   :  { %v1647_v23 = vadd.f32 %v1644_v4, %v1531_v34 }
0x140a   :  { %v1655_v56 = vsel %vm71_vm0, %v1647_v23, 0.0 }
0x140b   :  { %1656 = vadd.xlane.f32.xlu2 %v1655_v56 }
0x1413   :  { %1653 = vadd.xlane.f32.xlu2 %v1652_v6 }
0x147e   :  { %v1657_v7 = vpop.xlane.xlu2 %1656 }
0x147f   :  { %v1659_v8 = vmul.f32 %v1657_v7, %v2294_v10 }
0x1481   :  { %v1661_v9 = vsub.f32 %v1647_v23, %v1659_v8 }
0x1483   :  { %v1663_v11 = vmul.f32 %v1661_v9, %v1661_v9 }
0x1485   :  { %v1667_v12 = vsel %vm71_vm0, %v1663_v11, 0.0 }
0x1486   :  { %1668 = vadd.xlane.f32.xlu2 %v1667_v12  ;;  %v1654_v13 = vpop.xlane.xlu2 %1653 }
0x1487   :  { %v1658_v14 = vmul.f32 %v1654_v13, %v2294_v10 }
0x1489   :  { %v1660_v15 = vsub.f32 %v1646_v55, %v1658_v14 }
0x148b   :  { %v1662_v16 = vmul.f32 %v1660_v15, %v1660_v15 }
0x148d   :  { %v1664_v17 = vsel %vm71_vm0, %v1662_v16, 0.0 }
0x148e   :  { %1665 = vadd.xlane.f32.xlu2 %v1664_v17 }
0x14f9   :  { %v1669_v19 = vpop.xlane.xlu2 %1668 }
0x14fa   :  { %v1671_v21 = vmul.f32 %v1669_v19, %v2294_v10 }
0x14fc   :  { %v1673_v27 = vadd.f32 1e-12, %v1671_v21 }
0x14fe   :  { %2134 = vrsqrt.f32 %v1673_v27  ;;  %vm1690_vm15 = vweird.f32 %v1673_v27 }
0x1501   :  { %v1666_v28 = vpop.xlane.xlu2 %1665 }
0x1502   :  { %v1670_v29 = vmul.f32 %v1666_v28, %v2294_v10 }
0x1504   :  { %v2135_v20 = vpop.eup %2134  ;;  %v1672_v30 = vadd.f32 1e-12, %v1670_v29 }
0x1505   :  { %v1685_v33 = vmul.f32 %v2135_v20, %v1673_v27  ;;  %vm1691_vm14 = vweird.f32 %v2135_v20 }
0x1506   :  { %2136 = vrsqrt.f32 %v1672_v30  ;;  %vm1692_vm1 = vmor %vm1690_vm15, %vm1691_vm14  ;;  %vm1680_vm3 = vweird.f32 %v1672_v30 }
0x1507   :  { %v1686_v49 = vmul.f32 %v2135_v20, %v1685_v33 }
0x1509   :  { %v1687_v31 = vmul.f32 0.5, %v1686_v49 }
0x150b   :  { %v1688_v34 = vsub.f32 1.5, %v1687_v31 }
0x150c   :  { %v2137_v35 = vpop.eup %2136 }
0x150d   :  { %v1689_v26 = vmul.f32 %v2135_v20, %v1688_v34  ;;  %v1675_v36 = vmul.f32 %v2137_v35, %v1672_v30  ;;  %vm1681_vm2 = vweird.f32 %v2137_v35 }
0x150e   :  { %vm1682_vm4 = vmor %vm1680_vm3, %vm1681_vm2 }
0x150f   :  { %v1693_v50 = vsel %vm1692_vm1, %v2135_v20, %v1689_v26  ;;  %v1676_v32 = vmul.f32 %v2137_v35, %v1675_v36 }
0x1510   :  { %v1695_v10 = vmul.f32 %v1693_v50, %v1661_v9 }
0x1511   :  { %v1677_v38 = vmul.f32 0.5, %v1676_v32 }
0x1512   :  { %v1700_v40 = vmul.f32 %v2040_v37, %v1695_v10 }
0x1513   :  { %v1678_v39 = vsub.f32 1.5, %v1677_v38 }
0x1514   :  { %v1705_v59 = vadd.f32 %v2041_v41, %v1700_v40 }
0x1515   :  { %v1679_v42 = vmul.f32 %v2137_v35, %v1678_v39 }
0x1516   :  { %v1707_v47 = vrot.slane %v1705_v59, 7 }
0x1517   :  { %v1683_v43 = vsel %vm1682_vm4, %v2137_v35, %v1679_v42 }
0x1518   :  { %v1694_v44 = vmul.f32 %v1683_v43, %v1660_v15 }
0x151a   :  { %v1699_v63 = vmul.f32 %v2040_v37, %v1694_v44 }
0x151c   :  { %v1704_v46 = vadd.f32 %v2041_v41, %v1699_v63 }
0x151e   :  { %v1710_v48 = vsel %vm1709_vm5, %v1704_v46, %v1707_v47 }
0x151f   :  { %1953 = vmatmul.msk.f32.vlgmr.msrb.gmra.mxu0 %vm71_vm0, %v1710_v48 }
0x159c   :  { %v1739_v60 = vpop.f32.mrf.mxu0 }
0x159d   :  { %v1740_v51 = vadd.f32 %v2042_v58, %v1739_v60 }
0x159f   :  { %2138 = vtanh.f32 %v1740_v51 }
0x15a5   :  { %v2139_v61 = vpop.eup %2138 }
0x15a6   :  { %1954 = vmatmul.msk.f32.vlgmr.msrb.gmra.mxu1 %vm71_vm0, %v2139_v61 }
0x1623   :  { %v1771_v22 = vpop.f32.mrf.mxu1 }
0x1624   :  { %v1772_v0 = vadd.f32 %v2043_v62, %v1771_v22 }
0x1626   :  { %1774 = vst [vmem:[#allocation2] sm:$0x3] %v1772_v0 }
0x1627   :  { %1785 = dma.vmem_to_hbm [thread:$0]  %s1781_s11, 32, %s1783_s13, [#allocation3]  }
0x1628   :  { %2166 = dma.done.wait [#allocation3], 32  }
0x1629   :  { %2167 = vsyncadd [#allocation3], 4294967264 }
0x162a   :  { %1790 = vsyncpa [#allocation3], 1 }

</bundles_post_ra>
